<compile_context>
chip_gen: v7x
topology: tpu7x:2x2x1
jax: 0.10.0
libtpu: 0.0.40
codegen_flags: <defaults>
</compile_context>

<pallas_src>
import functools

import jax
import jax.numpy as jnp
import numpy as np
from jax import lax
from jax.experimental import pallas as pl
from jax.experimental.pallas import tpu as pltpu


# ---------------------------------------------------------------------------
# Fused LeNet kernel (one grid step = one batch block of `bb` images)
# ---------------------------------------------------------------------------
def _lenet_kernel(x_ref, w_ref, b_ref, out_ref,
                  c1_ref, p1_ref, c2_ref, p2_ref, *, bb):
    f32 = jnp.float32
    bf16 = jnp.bfloat16

    # ---------------- conv1 (5x5, 3->6) + bias + ReLU + 2x2 max-pool ----------
    # x_ref: (bb*32, 128) rows=(b,h), lanes=w*3+cin (96 used, rest zero), bf16.
    # Banded weights: per-kh (128, 256) blocks; even-wo columns in [0:128),
    # odd-wo columns in [128:256) (unused columns are exactly zero).
    x = x_ref[...]                                        # (bb*32, 128) bf16
    b1 = b_ref[0:1, :]                                    # (1, 256) f32
    accs = [None] * bb
    for kh in range(5):
        wk = w_ref[pl.ds(kh * 128, 128), :]               # (128, 256) bf16
        y = jnp.dot(x, wk, preferred_element_type=f32)    # (bb*32, 256) one push/kh
        for b in range(bb):
            sl = y[b * 32 + kh: b * 32 + kh + 28, :]      # (28, 256)
            accs[b] = sl if kh == 0 else accs[b] + sl
    for b in range(bb):
        a = jnp.maximum(accs[b] + b1, 0.0)                # bias + ReLU (f32)
        # pool along W: max of even-wo and odd-wo lane blocks (dense 128-lane store)
        c1_ref[pl.ds(b * 28, 28), :] = jnp.maximum(a[:, 0:128], a[:, 128:256])
    # pool along H for the whole block: strided row reads + one dense bf16 store
    p1_ref[...] = jnp.maximum(c1_ref[pl.ds(0, bb * 14, 2), :],
                              c1_ref[pl.ds(1, bb * 14, 2), :]).astype(bf16)

    # ---------------- conv2 (5x5, 6->16) + bias + ReLU + 2x2 max-pool ---------
    # p1_ref: (bb*14, 128) rows=(b,h1), lanes=w1*6+c1 (84 used, rest zero), bf16.
    p1 = p1_ref[...]                                      # loaded + cast once
    b2 = b_ref[1:2, :]
    accs2 = [None] * bb
    for kh in range(5):
        wk = w_ref[pl.ds(640 + kh * 128, 128), :]         # (128, 256) bf16
        y = jnp.dot(p1, wk, preferred_element_type=f32)   # (bb*14, 256)
        for b in range(bb):
            sl = y[b * 14 + kh: b * 14 + kh + 10, :]      # (10, 256)
            accs2[b] = sl if kh == 0 else accs2[b] + sl
    for b in range(bb):
        a = jnp.maximum(accs2[b] + b2, 0.0)
        c2_ref[pl.ds(b * 10, 10), :] = jnp.maximum(a[:, 0:128], a[:, 128:256])
    p2_ref[...] = jnp.maximum(c2_ref[pl.ds(0, bb * 5, 2), :],
                              c2_ref[pl.ds(1, bb * 5, 2), :])   # (bb*5, 128) f32

    # ---------------- fc1 -> fc2 -> fc3 (batched over the block) --------------
    # fc1 input row for image b = concat over h of p2 row (b*5+h); fc1 weights
    # are host-permuted to the in-kernel (h,w,c) order with 128-lane h-segments.
    h0 = jnp.concatenate([p2_ref[pl.ds(h, bb, 5), :] for h in range(5)],
                         axis=1).astype(bf16)             # (bb, 640)
    h1 = jnp.dot(h0, w_ref[pl.ds(1280, 640), pl.ds(0, 128)],
                 preferred_element_type=f32)
    h1 = jnp.maximum(h1 + b_ref[2:3, 0:128], 0.0)         # (bb, 128), cols>=120 zero
    h2 = jnp.dot(h1.astype(bf16), w_ref[pl.ds(1920, 128), pl.ds(0, 128)],
                 preferred_element_type=f32)
    h2 = jnp.maximum(h2 + b_ref[3:4, 0:128], 0.0)         # (bb, 128), cols>=84 zero
    h3 = jnp.dot(h2.astype(bf16), w_ref[pl.ds(2048, 128), pl.ds(0, 128)],
                 preferred_element_type=f32) + b_ref[4:5, 0:128]
    out_ref[...] = h3[:, 0:10].astype(out_ref.dtype)


# ---------------------------------------------------------------------------
# One-time parameter preparation (host-side numpy; hoisted out of the forward)
# ---------------------------------------------------------------------------
def prepare_params(p):
    """Repack PyTorch-convention parameters into two Pallas operands.

    weights (2176, 256) bf16:
      rows    0: 640  conv1 banded weights, 5 x (128, 256), K padded 96->128
      rows  640:1280  conv2 banded weights, 5 x (128, 256), K padded 84->128
      rows 1280:1920  fc1  (640, 128) in kernel feature order g = h*128+w*16+c
      rows 1920:2048  fc2  (128, 128) zero-padded
      rows 2048:2176  fc3  (128, 128) zero-padded
    biases (8, 256) f32: rows = [conv1, conv2, fc1, fc2, fc3] (zero-padded).
    All padding lanes/rows are exactly zero so pools/dots never see garbage.
    """
    def f32(a):
        return np.asarray(jax.device_get(a), dtype=np.float32)

    def conv_banded(w_oihw, bias, w_in):
        w_oihw = f32(w_oihw)
        cout, cin, k, _ = w_oihw.shape
        wo = w_in - k + 1
        half = wo // 2
        wt = np.transpose(w_oihw, (2, 3, 1, 0))            # (kh, kw, cin, cout)
        band = np.zeros((k, 128, 256), np.float32)         # K padded to 128 per kh
        for kh in range(k):
            for kw in range(k):
                for o in range(wo):
                    col = (o // 2) * cout + (0 if o % 2 == 0 else 128)
                    band[kh, (o + kw) * cin:(o + kw + 1) * cin,
                         col:col + cout] = wt[kh, kw]
        bt = np.zeros((256,), np.float32)
        bt[0:half * cout] = np.tile(f32(bias), half)
        bt[128:128 + half * cout] = np.tile(f32(bias), half)
        return band.reshape(k * 128, 256), bt

    band1, bias1 = conv_banded(p["conv1_w"], p["conv1_b"], 32)   # (640,256)
    band2, bias2 = conv_banded(p["conv2_w"], p["conv2_b"], 14)   # (640,256)

    # fc1: torch feature f = c*25 + h*5 + w  ->  kernel feature g = h*128 + w*16 + c
    w1 = f32(p["fc1_w"]).reshape(120, 16, 5, 5)                  # (n, c, h, w)
    wfc1 = np.zeros((640, 128), np.float32)
    for h in range(5):
        blk = np.transpose(w1[:, :, h, :], (2, 1, 0)).reshape(80, 120)
        wfc1[h * 128:h * 128 + 80, 0:120] = blk
    wfc2 = np.zeros((128, 128), np.float32)
    wfc2[0:120, 0:84] = f32(p["fc2_w"]).T
    wfc3 = np.zeros((128, 128), np.float32)
    wfc3[0:84, 0:10] = f32(p["fc3_w"]).T

    W = np.zeros((2176, 256), np.float32)
    W[0:640] = band1
    W[640:1280] = band2
    W[1280:1920, 0:128] = wfc1
    W[1920:2048, 0:128] = wfc2
    W[2048:2176, 0:128] = wfc3

    Bm = np.zeros((8, 256), np.float32)
    Bm[0] = bias1
    Bm[1] = bias2
    Bm[2, 0:120] = f32(p["fc1_b"])
    Bm[3, 0:84] = f32(p["fc2_b"])
    Bm[4, 0:10] = f32(p["fc3_b"])

    return {"weights": jnp.asarray(W, jnp.bfloat16),
            "biases": jnp.asarray(Bm, jnp.float32)}


# ---------------------------------------------------------------------------
# Forward wrapper (single pallas_call, batch-block grid axis marked parallel)
# ---------------------------------------------------------------------------
def lenet_forward_pallas(x_nchw, prep):
    B = x_nchw.shape[0]
    assert x_nchw.shape[1:] == (3, 32, 32)
    # Batch-block size: whole batch in one step when small; 8-image blocks
    # (parallel grid axis -> both v7x TensorCores) when B is a multiple of 8.
    bb = 8 if (B % 8 == 0) else B
    nb = B // bb

    # NCHW -> NHWC -> rows=(b,h), lanes=w*3+cin, zero-padded 96->128 lanes, bf16.
    x2d = jnp.transpose(x_nchw, (0, 2, 3, 1)).reshape(B * 32, 96)
    x2d = jnp.pad(x2d, ((0, 0), (0, 32))).astype(jnp.bfloat16)

    w = prep["weights"]
    bias = prep["biases"]

    return pl.pallas_call(
        functools.partial(_lenet_kernel, bb=bb),
        out_shape=jax.ShapeDtypeStruct((B, 10), jnp.float32),
        grid=(nb,),
        in_specs=[
            pl.BlockSpec((bb * 32, 128), lambda i: (i, 0)),   # per-block images
            pl.BlockSpec(w.shape, lambda i: (0, 0)),          # weights resident
            pl.BlockSpec(bias.shape, lambda i: (0, 0)),       # biases resident
        ],
        out_specs=pl.BlockSpec((bb, 10), lambda i: (i, 0)),
        scratch_shapes=[
            pltpu.VMEM((bb * 28, 128), jnp.float32),    # conv1 relu+Wpool rows
            pltpu.VMEM((bb * 14, 128), jnp.bfloat16),   # pool1 activations (bf16)
            pltpu.VMEM((bb * 10, 128), jnp.float32),    # conv2 relu+Wpool rows
            pltpu.VMEM((bb * 5, 128), jnp.float32),     # pool2 activations
        ],
        compiler_params=pltpu.CompilerParams(dimension_semantics=("parallel",)),
    )(x2d, w, bias)


# ---------------------------------------------------------------------------
# Pure-JAX reference (mirrors the PyTorch module in NCHW, f32)
# ---------------------------------------------------------------------------
def lenet_reference(x_nchw, p):
    def conv(x, w, b):
        y = lax.conv_general_dilated(x, w, (1, 1), "VALID",
                                     dimension_numbers=("NCHW", "OIHW", "NCHW"))
        return y + b[None, :, None, None]

    def pool(x):
        B, C, H, W = x.shape
        return jnp.max(x.reshape(B, C, H // 2, 2, W // 2, 2), axis=(3, 5))

    y = pool(jnp.maximum(conv(x_nchw, p["conv1_w"], p["conv1_b"]), 0.0))
    y = pool(jnp.maximum(conv(y, p["conv2_w"], p["conv2_b"]), 0.0))
    y = y.reshape(y.shape[0], -1)
    y = jnp.maximum(y @ p["fc1_w"].T + p["fc1_b"], 0.0)
    y = jnp.maximum(y @ p["fc2_w"].T + p["fc2_b"], 0.0)
    return y @ p["fc3_w"].T + p["fc3_b"]


# ---------------------------------------------------------------------------
# Deterministic parameter init (PyTorch shape conventions)
# ---------------------------------------------------------------------------
def init_params(key):
    ks = jax.random.split(key, 10)

    def n(k, shape, scale):
        return (scale * jax.random.normal(k, shape)).astype(jnp.float32)

    return {
        "conv1_w": n(ks[0], (6, 3, 5, 5), 0.05),
        "conv1_b": n(ks[1], (6,), 0.05),
        "conv2_w": n(ks[2], (16, 6, 5, 5), 0.05),
        "conv2_b": n(ks[3], (16,), 0.05),
        "fc1_w":  n(ks[4], (120, 400), 0.05),
        "fc1_b":  n(ks[5], (120,), 0.05),
        "fc2_w":  n(ks[6], (84, 120), 0.05),
        "fc2_b":  n(ks[7], (84,), 0.05),
        "fc3_w":  n(ks[8], (10, 84), 0.05),
        "fc3_b":  n(ks[9], (10,), 0.05),
    }


if __name__ == "__main__":
    key = jax.random.PRNGKey(0)
    k_param, k_x = jax.random.split(key)
    params = init_params(k_param)
    prep = prepare_params(params)            # one-time weight repacking (hoisted)
    # LeNet's fc1 (16*5*5) implies 32x32 spatial input; small batch of 2.
    x = jax.random.normal(k_x, (2, 3, 32, 32), dtype=jnp.float32)

    fwd = jax.jit(lenet_forward_pallas)
    out = jax.block_until_ready(fwd(x, prep))
    ref = jax.block_until_ready(lenet_reference(x, params))

    assert out.shape == (2, 10) and out.dtype == jnp.float32
    np.testing.assert_allclose(np.asarray(out), np.asarray(ref), rtol=2e-2, atol=2e-2)
    print("KERNEL_OK")
</pallas_src>

<mosaic_0001>
module attributes {stable_mosaic.version = 11 : i64} {
  func.func @_lenet_kernel(%arg0: i32, %arg1: memref<64x128xbf16, #tpu.memory_space<vmem>>, %arg2: memref<2176x256xbf16, #tpu.memory_space<vmem>>, %arg3: memref<8x256xf32, #tpu.memory_space<vmem>>, %arg4: memref<2x10xf32, #tpu.memory_space<vmem>>, %arg5: memref<56x128xf32, #tpu.memory_space<vmem>>, %arg6: memref<28x128xbf16, #tpu.memory_space<vmem>>, %arg7: memref<20x128xf32, #tpu.memory_space<vmem>>, %arg8: memref<10x128xf32, #tpu.memory_space<vmem>>) attributes {dimension_semantics = [#tpu.dimension_semantics<parallel>], iteration_bounds = array<i64: 1>, scalar_prefetch = 0 : i64, scratch_operands = 4 : i64, tpu.core_type = #tpu.core_type<tc>, window_params = [{transform_indices = @transform_0, window_bounds = array<i64: 64, 128>}, {pipeline_mode = #tpu.pipeline_mode<synchronous>, transform_indices = @transform_1, window_bounds = array<i64: 2176, 256>}, {pipeline_mode = #tpu.pipeline_mode<synchronous>, transform_indices = @transform_2, window_bounds = array<i64: 8, 256>}, {transform_indices = @transform_3, window_bounds = array<i64: 2, 10>}]} {
    %c0 = arith.constant 0 : index
    %c0_0 = arith.constant 0 : index
    %0 = vector.load %arg1[%c0, %c0_0] : memref<64x128xbf16, #tpu.memory_space<vmem>>, vector<64x128xbf16>
    %c0_1 = arith.constant 0 : index
    %c0_2 = arith.constant 0 : index
    %1 = vector.load %arg3[%c0_1, %c0_2] : memref<8x256xf32, #tpu.memory_space<vmem>>, vector<1x256xf32>
    %c0_3 = arith.constant 0 : index
    %c0_4 = arith.constant 0 : index
    %2 = vector.load %arg2[%c0_3, %c0_4] : memref<2176x256xbf16, #tpu.memory_space<vmem>>, vector<128x256xbf16>
    %cst = arith.constant dense<0.000000e+00> : vector<64x256xf32>
    %3 = tpu.matmul %0, %2, %cst {dimension_numbers = #tpu.dot_dimension_numbers<[1], [0], [0], [1], [0, 0, 1, 1], [], []>} : vector<64x128xbf16>, vector<128x256xbf16>, vector<64x256xf32> -> vector<64x256xf32>
    %4 = vector.extract_strided_slice %3 {offsets = [0, 0], sizes = [28, 256], strides = [1, 1]} : vector<64x256xf32> to vector<28x256xf32>
    %5 = vector.extract_strided_slice %3 {offsets = [32, 0], sizes = [28, 256], strides = [1, 1]} : vector<64x256xf32> to vector<28x256xf32>
    %c128 = arith.constant 128 : index
    %c0_5 = arith.constant 0 : index
    %6 = vector.load %arg2[%c128, %c0_5] : memref<2176x256xbf16, #tpu.memory_space<vmem>>, vector<128x256xbf16>
    %cst_6 = arith.constant dense<0.000000e+00> : vector<64x256xf32>
    %7 = tpu.matmul %0, %6, %cst_6 {dimension_numbers = #tpu.dot_dimension_numbers<[1], [0], [0], [1], [0, 0, 1, 1], [], []>} : vector<64x128xbf16>, vector<128x256xbf16>, vector<64x256xf32> -> vector<64x256xf32>
    %8 = vector.extract_strided_slice %7 {offsets = [1, 0], sizes = [28, 256], strides = [1, 1]} : vector<64x256xf32> to vector<28x256xf32>
    %9 = arith.addf %4, %8 : vector<28x256xf32>
    %10 = vector.extract_strided_slice %7 {offsets = [33, 0], sizes = [28, 256], strides = [1, 1]} : vector<64x256xf32> to vector<28x256xf32>
    %11 = arith.addf %5, %10 : vector<28x256xf32>
    %c256 = arith.constant 256 : index
    %c0_7 = arith.constant 0 : index
    %12 = vector.load %arg2[%c256, %c0_7] : memref<2176x256xbf16, #tpu.memory_space<vmem>>, vector<128x256xbf16>
    %cst_8 = arith.constant dense<0.000000e+00> : vector<64x256xf32>
    %13 = tpu.matmul %0, %12, %cst_8 {dimension_numbers = #tpu.dot_dimension_numbers<[1], [0], [0], [1], [0, 0, 1, 1], [], []>} : vector<64x128xbf16>, vector<128x256xbf16>, vector<64x256xf32> -> vector<64x256xf32>
    %14 = vector.extract_strided_slice %13 {offsets = [2, 0], sizes = [28, 256], strides = [1, 1]} : vector<64x256xf32> to vector<28x256xf32>
    %15 = arith.addf %9, %14 : vector<28x256xf32>
    %16 = vector.extract_strided_slice %13 {offsets = [34, 0], sizes = [28, 256], strides = [1, 1]} : vector<64x256xf32> to vector<28x256xf32>
    %17 = arith.addf %11, %16 : vector<28x256xf32>
    %c384 = arith.constant 384 : index
    %c0_9 = arith.constant 0 : index
    %18 = vector.load %arg2[%c384, %c0_9] : memref<2176x256xbf16, #tpu.memory_space<vmem>>, vector<128x256xbf16>
    %cst_10 = arith.constant dense<0.000000e+00> : vector<64x256xf32>
    %19 = tpu.matmul %0, %18, %cst_10 {dimension_numbers = #tpu.dot_dimension_numbers<[1], [0], [0], [1], [0, 0, 1, 1], [], []>} : vector<64x128xbf16>, vector<128x256xbf16>, vector<64x256xf32> -> vector<64x256xf32>
    %20 = vector.extract_strided_slice %19 {offsets = [3, 0], sizes = [28, 256], strides = [1, 1]} : vector<64x256xf32> to vector<28x256xf32>
    %21 = arith.addf %15, %20 : vector<28x256xf32>
    %22 = vector.extract_strided_slice %19 {offsets = [35, 0], sizes = [28, 256], strides = [1, 1]} : vector<64x256xf32> to vector<28x256xf32>
    %23 = arith.addf %17, %22 : vector<28x256xf32>
    %c512 = arith.constant 512 : index
    %c0_11 = arith.constant 0 : index
    %24 = vector.load %arg2[%c512, %c0_11] : memref<2176x256xbf16, #tpu.memory_space<vmem>>, vector<128x256xbf16>
    %cst_12 = arith.constant dense<0.000000e+00> : vector<64x256xf32>
    %25 = tpu.matmul %0, %24, %cst_12 {dimension_numbers = #tpu.dot_dimension_numbers<[1], [0], [0], [1], [0, 0, 1, 1], [], []>} : vector<64x128xbf16>, vector<128x256xbf16>, vector<64x256xf32> -> vector<64x256xf32>
    %26 = vector.extract_strided_slice %25 {offsets = [4, 0], sizes = [28, 256], strides = [1, 1]} : vector<64x256xf32> to vector<28x256xf32>
    %27 = arith.addf %21, %26 : vector<28x256xf32>
    %28 = vector.extract_strided_slice %25 {offsets = [36, 0], sizes = [28, 256], strides = [1, 1]} : vector<64x256xf32> to vector<28x256xf32>
    %29 = arith.addf %23, %28 : vector<28x256xf32>
    %30 = vector.broadcast %1 : vector<1x256xf32> to vector<28x256xf32>
    %31 = arith.addf %27, %30 : vector<28x256xf32>
    %cst_13 = arith.constant 0.000000e+00 : f32
    %32 = vector.broadcast %cst_13 : f32 to vector<28x256xf32>
    %33 = arith.maximumf %31, %32 : vector<28x256xf32>
    %34 = vector.extract_strided_slice %33 {offsets = [0, 0], sizes = [28, 128], strides = [1, 1]} : vector<28x256xf32> to vector<28x128xf32>
    %35 = vector.extract_strided_slice %33 {offsets = [0, 128], sizes = [28, 128], strides = [1, 1]} : vector<28x256xf32> to vector<28x128xf32>
    %36 = arith.maximumf %34, %35 : vector<28x128xf32>
    %c0_14 = arith.constant 0 : index
    %c0_15 = arith.constant 0 : index
    %37 = vector.load %arg5[%c0_14, %c0_15] : memref<56x128xf32, #tpu.memory_space<vmem>>, vector<28x128xf32>
    tpu.vector_store %arg5[%c0_14, %c0_15], %36 {strides = array<i32>} : memref<56x128xf32, #tpu.memory_space<vmem>>, vector<28x128xf32>,
    %38 = vector.broadcast %1 : vector<1x256xf32> to vector<28x256xf32>
    %39 = arith.addf %29, %38 : vector<28x256xf32>
    %cst_16 = arith.constant 0.000000e+00 : f32
    %40 = vector.broadcast %cst_16 : f32 to vector<28x256xf32>
    %41 = arith.maximumf %39, %40 : vector<28x256xf32>
    %42 = vector.extract_strided_slice %41 {offsets = [0, 0], sizes = [28, 128], strides = [1, 1]} : vector<28x256xf32> to vector<28x128xf32>
    %43 = vector.extract_strided_slice %41 {offsets = [0, 128], sizes = [28, 128], strides = [1, 1]} : vector<28x256xf32> to vector<28x128xf32>
    %44 = arith.maximumf %42, %43 : vector<28x128xf32>
    %c28 = arith.constant 28 : index
    %c0_17 = arith.constant 0 : index
    %45 = vector.load %arg5[%c28, %c0_17] : memref<56x128xf32, #tpu.memory_space<vmem>>, vector<28x128xf32>
    tpu.vector_store %arg5[%c28, %c0_17], %44 {strides = array<i32>} : memref<56x128xf32, #tpu.memory_space<vmem>>, vector<28x128xf32>,
    %c0_18 = arith.constant 0 : index
    %c0_19 = arith.constant 0 : index
    %46 = tpu.strided_load %arg5[%c0_18, %c0_19] {strides = array<i32: 2, 1>} : memref<56x128xf32, #tpu.memory_space<vmem>>, vector<28x128xf32>
    %c1 = arith.constant 1 : index
    %c0_20 = arith.constant 0 : index
    %47 = tpu.strided_load %arg5[%c1, %c0_20] {strides = array<i32: 2, 1>} : memref<56x128xf32, #tpu.memory_space<vmem>>, vector<28x128xf32>
    %48 = arith.maximumf %46, %47 : vector<28x128xf32>
    %49 = arith.truncf %48 : vector<28x128xf32> to vector<28x128xbf16>
    %c0_21 = arith.constant 0 : index
    %c0_22 = arith.constant 0 : index
    %50 = vector.load %arg6[%c0_21, %c0_22] : memref<28x128xbf16, #tpu.memory_space<vmem>>, vector<28x128xbf16>
    tpu.vector_store %arg6[%c0_21, %c0_22], %49 {strides = array<i32>} : memref<28x128xbf16, #tpu.memory_space<vmem>>, vector<28x128xbf16>,
    %c0_23 = arith.constant 0 : index
    %c0_24 = arith.constant 0 : index
    %51 = vector.load %arg6[%c0_23, %c0_24] : memref<28x128xbf16, #tpu.memory_space<vmem>>, vector<28x128xbf16>
    %c1_25 = arith.constant 1 : index
    %c0_26 = arith.constant 0 : index
    %52 = vector.load %arg3[%c1_25, %c0_26] : memref<8x256xf32, #tpu.memory_space<vmem>>, vector<1x256xf32>
    %c640 = arith.constant 640 : index
    %c0_27 = arith.constant 0 : index
    %53 = vector.load %arg2[%c640, %c0_27] : memref<2176x256xbf16, #tpu.memory_space<vmem>>, vector<128x256xbf16>
    %cst_28 = arith.constant dense<0.000000e+00> : vector<28x256xf32>
    %54 = tpu.matmul %51, %53, %cst_28 {dimension_numbers = #tpu.dot_dimension_numbers<[1], [0], [0], [1], [0, 0, 1, 1], [], []>} : vector<28x128xbf16>, vector<128x256xbf16>, vector<28x256xf32> -> vector<28x256xf32>
    %55 = vector.extract_strided_slice %54 {offsets = [0, 0], sizes = [10, 256], strides = [1, 1]} : vector<28x256xf32> to vector<10x256xf32>
    %56 = vector.extract_strided_slice %54 {offsets = [14, 0], sizes = [10, 256], strides = [1, 1]} : vector<28x256xf32> to vector<10x256xf32>
    %c768 = arith.constant 768 : index
    %c0_29 = arith.constant 0 : index
    %57 = vector.load %arg2[%c768, %c0_29] : memref<2176x256xbf16, #tpu.memory_space<vmem>>, vector<128x256xbf16>
    %cst_30 = arith.constant dense<0.000000e+00> : vector<28x256xf32>
    %58 = tpu.matmul %51, %57, %cst_30 {dimension_numbers = #tpu.dot_dimension_numbers<[1], [0], [0], [1], [0, 0, 1, 1], [], []>} : vector<28x128xbf16>, vector<128x256xbf16>, vector<28x256xf32> -> vector<28x256xf32>
    %59 = vector.extract_strided_slice %58 {offsets = [1, 0], sizes = [10, 256], strides = [1, 1]} : vector<28x256xf32> to vector<10x256xf32>
    %60 = arith.addf %55, %59 : vector<10x256xf32>
    %61 = vector.extract_strided_slice %58 {offsets = [15, 0], sizes = [10, 256], strides = [1, 1]} : vector<28x256xf32> to vector<10x256xf32>
    %62 = arith.addf %56, %61 : vector<10x256xf32>
    %c896 = arith.constant 896 : index
    %c0_31 = arith.constant 0 : index
    %63 = vector.load %arg2[%c896, %c0_31] : memref<2176x256xbf16, #tpu.memory_space<vmem>>, vector<128x256xbf16>
    %cst_32 = arith.constant dense<0.000000e+00> : vector<28x256xf32>
    %64 = tpu.matmul %51, %63, %cst_32 {dimension_numbers = #tpu.dot_dimension_numbers<[1], [0], [0], [1], [0, 0, 1, 1], [], []>} : vector<28x128xbf16>, vector<128x256xbf16>, vector<28x256xf32> -> vector<28x256xf32>
    %65 = vector.extract_strided_slice %64 {offsets = [2, 0], sizes = [10, 256], strides = [1, 1]} : vector<28x256xf32> to vector<10x256xf32>
    %66 = arith.addf %60, %65 : vector<10x256xf32>
    %67 = vector.extract_strided_slice %64 {offsets = [16, 0], sizes = [10, 256], strides = [1, 1]} : vector<28x256xf32> to vector<10x256xf32>
    %68 = arith.addf %62, %67 : vector<10x256xf32>
    %c1024 = arith.constant 1024 : index
    %c0_33 = arith.constant 0 : index
    %69 = vector.load %arg2[%c1024, %c0_33] : memref<2176x256xbf16, #tpu.memory_space<vmem>>, vector<128x256xbf16>
    %cst_34 = arith.constant dense<0.000000e+00> : vector<28x256xf32>
    %70 = tpu.matmul %51, %69, %cst_34 {dimension_numbers = #tpu.dot_dimension_numbers<[1], [0], [0], [1], [0, 0, 1, 1], [], []>} : vector<28x128xbf16>, vector<128x256xbf16>, vector<28x256xf32> -> vector<28x256xf32>
    %71 = vector.extract_strided_slice %70 {offsets = [3, 0], sizes = [10, 256], strides = [1, 1]} : vector<28x256xf32> to vector<10x256xf32>
    %72 = arith.addf %66, %71 : vector<10x256xf32>
    %73 = vector.extract_strided_slice %70 {offsets = [17, 0], sizes = [10, 256], strides = [1, 1]} : vector<28x256xf32> to vector<10x256xf32>
    %74 = arith.addf %68, %73 : vector<10x256xf32>
    %c1152 = arith.constant 1152 : index
    %c0_35 = arith.constant 0 : index
    %75 = vector.load %arg2[%c1152, %c0_35] : memref<2176x256xbf16, #tpu.memory_space<vmem>>, vector<128x256xbf16>
    %cst_36 = arith.constant dense<0.000000e+00> : vector<28x256xf32>
    %76 = tpu.matmul %51, %75, %cst_36 {dimension_numbers = #tpu.dot_dimension_numbers<[1], [0], [0], [1], [0, 0, 1, 1], [], []>} : vector<28x128xbf16>, vector<128x256xbf16>, vector<28x256xf32> -> vector<28x256xf32>
    %77 = vector.extract_strided_slice %76 {offsets = [4, 0], sizes = [10, 256], strides = [1, 1]} : vector<28x256xf32> to vector<10x256xf32>
    %78 = arith.addf %72, %77 : vector<10x256xf32>
    %79 = vector.extract_strided_slice %76 {offsets = [18, 0], sizes = [10, 256], strides = [1, 1]} : vector<28x256xf32> to vector<10x256xf32>
    %80 = arith.addf %74, %79 : vector<10x256xf32>
    %81 = vector.broadcast %52 : vector<1x256xf32> to vector<10x256xf32>
    %82 = arith.addf %78, %81 : vector<10x256xf32>
    %cst_37 = arith.constant 0.000000e+00 : f32
    %83 = vector.broadcast %cst_37 : f32 to vector<10x256xf32>
    %84 = arith.maximumf %82, %83 : vector<10x256xf32>
    %85 = vector.extract_strided_slice %84 {offsets = [0, 0], sizes = [10, 128], strides = [1, 1]} : vector<10x256xf32> to vector<10x128xf32>
    %86 = vector.extract_strided_slice %84 {offsets = [0, 128], sizes = [10, 128], strides = [1, 1]} : vector<10x256xf32> to vector<10x128xf32>
    %87 = arith.maximumf %85, %86 : vector<10x128xf32>
    %c0_38 = arith.constant 0 : index
    %c0_39 = arith.constant 0 : index
    %88 = vector.load %arg7[%c0_38, %c0_39] : memref<20x128xf32, #tpu.memory_space<vmem>>, vector<10x128xf32>
    tpu.vector_store %arg7[%c0_38, %c0_39], %87 {strides = array<i32>} : memref<20x128xf32, #tpu.memory_space<vmem>>, vector<10x128xf32>,
    %89 = vector.broadcast %52 : vector<1x256xf32> to vector<10x256xf32>
    %90 = arith.addf %80, %89 : vector<10x256xf32>
    %cst_40 = arith.constant 0.000000e+00 : f32
    %91 = vector.broadcast %cst_40 : f32 to vector<10x256xf32>
    %92 = arith.maximumf %90, %91 : vector<10x256xf32>
    %93 = vector.extract_strided_slice %92 {offsets = [0, 0], sizes = [10, 128], strides = [1, 1]} : vector<10x256xf32> to vector<10x128xf32>
    %94 = vector.extract_strided_slice %92 {offsets = [0, 128], sizes = [10, 128], strides = [1, 1]} : vector<10x256xf32> to vector<10x128xf32>
    %95 = arith.maximumf %93, %94 : vector<10x128xf32>
    %c10 = arith.constant 10 : index
    %c0_41 = arith.constant 0 : index
    %96 = vector.load %arg7[%c10, %c0_41] : memref<20x128xf32, #tpu.memory_space<vmem>>, vector<10x128xf32>
    tpu.vector_store %arg7[%c10, %c0_41], %95 {strides = array<i32>} : memref<20x128xf32, #tpu.memory_space<vmem>>, vector<10x128xf32>,
    %c0_42 = arith.constant 0 : index
    %c0_43 = arith.constant 0 : index
    %97 = tpu.strided_load %arg7[%c0_42, %c0_43] {strides = array<i32: 2, 1>} : memref<20x128xf32, #tpu.memory_space<vmem>>, vector<10x128xf32>
    %c1_44 = arith.constant 1 : index
    %c0_45 = arith.constant 0 : index
    %98 = tpu.strided_load %arg7[%c1_44, %c0_45] {strides = array<i32: 2, 1>} : memref<20x128xf32, #tpu.memory_space<vmem>>, vector<10x128xf32>
    %99 = arith.maximumf %97, %98 : vector<10x128xf32>
    %c0_46 = arith.constant 0 : index
    %c0_47 = arith.constant 0 : index
    %100 = vector.load %arg8[%c0_46, %c0_47] : memref<10x128xf32, #tpu.memory_space<vmem>>, vector<10x128xf32>
    tpu.vector_store %arg8[%c0_46, %c0_47], %99 {strides = array<i32>} : memref<10x128xf32, #tpu.memory_space<vmem>>, vector<10x128xf32>,
    %c0_48 = arith.constant 0 : index
    %c0_49 = arith.constant 0 : index
    %101 = tpu.strided_load %arg8[%c0_48, %c0_49] {strides = array<i32: 5, 1>} : memref<10x128xf32, #tpu.memory_space<vmem>>, vector<2x128xf32>
    %c1_50 = arith.constant 1 : index
    %c0_51 = arith.constant 0 : index
    %102 = tpu.strided_load %arg8[%c1_50, %c0_51] {strides = array<i32: 5, 1>} : memref<10x128xf32, #tpu.memory_space<vmem>>, vector<2x128xf32>
    %c2 = arith.constant 2 : index
    %c0_52 = arith.constant 0 : index
    %103 = tpu.strided_load %arg8[%c2, %c0_52] {strides = array<i32: 5, 1>} : memref<10x128xf32, #tpu.memory_space<vmem>>, vector<2x128xf32>
    %c3 = arith.constant 3 : index
    %c0_53 = arith.constant 0 : index
    %104 = tpu.strided_load %arg8[%c3, %c0_53] {strides = array<i32: 5, 1>} : memref<10x128xf32, #tpu.memory_space<vmem>>, vector<2x128xf32>
    %c4 = arith.constant 4 : index
    %c0_54 = arith.constant 0 : index
    %105 = tpu.strided_load %arg8[%c4, %c0_54] {strides = array<i32: 5, 1>} : memref<10x128xf32, #tpu.memory_space<vmem>>, vector<2x128xf32>
    %106 = tpu.concatenate %101, %102, %103, %104, %105 in 1 : vector<2x128xf32>, vector<2x128xf32>, vector<2x128xf32>, vector<2x128xf32>, vector<2x128xf32> -> vector<2x640xf32>
    %107 = arith.truncf %106 : vector<2x640xf32> to vector<2x640xbf16>
    %c1280 = arith.constant 1280 : index
    %c0_55 = arith.constant 0 : index
    %108 = vector.load %arg2[%c1280, %c0_55] : memref<2176x256xbf16, #tpu.memory_space<vmem>>, vector<640x128xbf16>
    %cst_56 = arith.constant dense<0.000000e+00> : vector<2x128xf32>
    %109 = tpu.matmul %107, %108, %cst_56 {dimension_numbers = #tpu.dot_dimension_numbers<[1], [0], [0], [1], [0, 0, 1, 1], [], []>} : vector<2x640xbf16>, vector<640x128xbf16>, vector<2x128xf32> -> vector<2x128xf32>
    %c2_57 = arith.constant 2 : index
    %c0_58 = arith.constant 0 : index
    %110 = vector.load %arg3[%c2_57, %c0_58] : memref<8x256xf32, #tpu.memory_space<vmem>>, vector<1x128xf32>
    %111 = vector.broadcast %110 : vector<1x128xf32> to vector<2x128xf32>
    %112 = arith.addf %109, %111 : vector<2x128xf32>
    %cst_59 = arith.constant 0.000000e+00 : f32
    %113 = vector.broadcast %cst_59 : f32 to vector<2x128xf32>
    %114 = arith.maximumf %112, %113 : vector<2x128xf32>
    %115 = arith.truncf %114 : vector<2x128xf32> to vector<2x128xbf16>
    %c1920 = arith.constant 1920 : index
    %c0_60 = arith.constant 0 : index
    %116 = vector.load %arg2[%c1920, %c0_60] : memref<2176x256xbf16, #tpu.memory_space<vmem>>, vector<128x128xbf16>
    %cst_61 = arith.constant dense<0.000000e+00> : vector<2x128xf32>
    %117 = tpu.matmul %115, %116, %cst_61 {dimension_numbers = #tpu.dot_dimension_numbers<[1], [0], [0], [1], [0, 0, 1, 1], [], []>} : vector<2x128xbf16>, vector<128x128xbf16>, vector<2x128xf32> -> vector<2x128xf32>
    %c3_62 = arith.constant 3 : index
    %c0_63 = arith.constant 0 : index
    %118 = vector.load %arg3[%c3_62, %c0_63] : memref<8x256xf32, #tpu.memory_space<vmem>>, vector<1x128xf32>
    %119 = vector.broadcast %118 : vector<1x128xf32> to vector<2x128xf32>
    %120 = arith.addf %117, %119 : vector<2x128xf32>
    %cst_64 = arith.constant 0.000000e+00 : f32
    %121 = vector.broadcast %cst_64 : f32 to vector<2x128xf32>
    %122 = arith.maximumf %120, %121 : vector<2x128xf32>
    %123 = arith.truncf %122 : vector<2x128xf32> to vector<2x128xbf16>
    %c2048 = arith.constant 2048 : index
    %c0_65 = arith.constant 0 : index
    %124 = vector.load %arg2[%c2048, %c0_65] : memref<2176x256xbf16, #tpu.memory_space<vmem>>, vector<128x128xbf16>
    %cst_66 = arith.constant dense<0.000000e+00> : vector<2x128xf32>
    %125 = tpu.matmul %123, %124, %cst_66 {dimension_numbers = #tpu.dot_dimension_numbers<[1], [0], [0], [1], [0, 0, 1, 1], [], []>} : vector<2x128xbf16>, vector<128x128xbf16>, vector<2x128xf32> -> vector<2x128xf32>
    %c4_67 = arith.constant 4 : index
    %c0_68 = arith.constant 0 : index
    %126 = vector.load %arg3[%c4_67, %c0_68] : memref<8x256xf32, #tpu.memory_space<vmem>>, vector<1x128xf32>
    %127 = vector.broadcast %126 : vector<1x128xf32> to vector<2x128xf32>
    %128 = arith.addf %125, %127 : vector<2x128xf32>
    %129 = vector.extract_strided_slice %128 {offsets = [0, 0], sizes = [2, 10], strides = [1, 1]} : vector<2x128xf32> to vector<2x10xf32>
    %c0_69 = arith.constant 0 : index
    %c0_70 = arith.constant 0 : index
    %130 = vector.load %arg4[%c0_69, %c0_70] : memref<2x10xf32, #tpu.memory_space<vmem>>, vector<2x10xf32>
    tpu.vector_store %arg4[%c0_69, %c0_70], %129 {strides = array<i32>} : memref<2x10xf32, #tpu.memory_space<vmem>>, vector<2x10xf32>,
    return
  }
  func.func @transform_0(%arg0: i32) -> (i32, i32) {
    %c0_i32 = arith.constant 0 : i32
    %c0_i32_0 = arith.constant 0 : i32
    return %arg0, %c0_i32 : i32, i32
  }
  func.func @transform_1(%arg0: i32) -> (i32, i32) {
    %c0_i32 = arith.constant 0 : i32
    %c0_i32_0 = arith.constant 0 : i32
    %c0_i32_1 = arith.constant 0 : i32
    return %c0_i32, %c0_i32_0 : i32, i32
  }
  func.func @transform_2(%arg0: i32) -> (i32, i32) {
    %c0_i32 = arith.constant 0 : i32
    %c0_i32_0 = arith.constant 0 : i32
    %c0_i32_1 = arith.constant 0 : i32
    return %c0_i32, %c0_i32_0 : i32, i32
  }
  func.func @transform_3(%arg0: i32) -> (i32, i32) {
    %c0_i32 = arith.constant 0 : i32
    %c0_i32_0 = arith.constant 0 : i32
    return %arg0, %c0_i32 : i32, i32
  }
}

</mosaic_0001>

<bundles_post_ra>
// kernel: lenet_forward_pallas.1
= control target key start
LH: loop header
LB: loop body
LE: loop exit
PB: predicated region body
PF: predicated region fallthrough
CT: control target
= control target key end

     0   :  { %8 = vsyncpa [#allocation7], 0  ;;  %s4086_s0 = inlined_call_operand.vmem [shape: bf16[64,128], index: 0, kind: input, shape index: {}]   ;;  %s4087_s1 = inlined_call_operand.hbm [shape: bf16[2176,256], index: 1, kind: input, shape index: {}]   ;;  %s4088_s2 = inlined_call_operand.hbm [shape: f32[8,256], index: 2, kind: input, shape index: {}]   ;;  %s4089_s3 = inlined_call_operand.hbm [shape: f32[2,10], index: 3, kind: output, shape index: {}]  }
   0x1   :  { %9 = vsyncpa [#allocation10], 0 }
   0x2   :  { %10 = vsyncpa [#allocation8], 0  ;;  %s3714_s12 = smov [#allocation6]   ;;  %s3642_s16 = scalar_lea.hbm %s4087_s1, 34816 }
   0x3   :  { %s18_s13 = sshll.u32 %s3714_s12, 4  ;;  %p3643_p0 = scmp.ne.s32.totalorder %s4087_s1, %s3642_s16  ;;  %s19_s13 = int_to_ptr.vmem [resolvable:$true] %s18_s13 }
   0x4   :  { %p3646_p1 = scmp.lt.u32.totalorder %s3642_s16, %s4087_s1 }
   0x6   :  { %p3648_p2 = pnand %p3646_p1, %p3643_p0 }
   0x8   :  { %3651 = shalt.err (!%p3648_p2)
}
   0x9   :  { %s3652_s21 = scalar_lea.vmem %s19_s13, 34816  ;;  %p3657_p4 = scmp.lt.s32.totalorder %s19_s13, %s19_s13 }
   0xa   :  { %p3653_p3 = scmp.ne.s32.totalorder %s19_s13, %s3652_s21  ;;  %p3658_p5 = scmp.lt.s32.totalorder %s3652_s21, %s3652_s21 }
   0xc   :  { %p3659_p6 = por %p3658_p5, %p3657_p4 }
   0xe   :  { %p3660_p7 = pnand %p3659_p6, %p3653_p3 }
  0x10   :  { %3663 = shalt.err (!%p3660_p7)
}
  0x11   :  { %s3715_s22 = smov 128   ;;  %s3716_s23 = smov 8  }
  0x12   :  { %24 = dma.hbm_to_vmem [thread:$0]  %s4087_s1, 34816, %s19_s13, [#allocation7], %s3715_s22, %s3715_s22, %s3716_s23  }
  0x13   :  { %s3717_s26 = smov [#allocation9]   ;;  %s3664_s30 = scalar_lea.hbm %s4088_s2, 256 }
  0x14   :  { %s31_s27 = sshll.u32 %s3717_s26, 4  ;;  %p3665_p8 = scmp.ne.s32.totalorder %s4088_s2, %s3664_s30  ;;  %s32_s27 = int_to_ptr.vmem [resolvable:$true] %s31_s27 }
  0x15   :  { %p3668_p9 = scmp.lt.u32.totalorder %s3664_s30, %s4088_s2 }
  0x17   :  { %p3670_p10 = pnand %p3668_p9, %p3665_p8 }
  0x19   :  { %3673 = shalt.err (!%p3670_p10)
}
  0x1a   :  { %s3674_s8 = scalar_lea.vmem %s32_s27, 256  ;;  %p3679_p12 = scmp.lt.s32.totalorder %s32_s27, %s32_s27 }
  0x1b   :  { %p3675_p11 = scmp.ne.s32.totalorder %s32_s27, %s3674_s8  ;;  %p3680_p13 = scmp.lt.s32.totalorder %s3674_s8, %s3674_s8 }
  0x1d   :  { %p3681_p0 = por %p3680_p13, %p3679_p12 }
  0x1f   :  { %p3682_p1 = pnand %p3681_p0, %p3675_p11 }
  0x21   :  { %3685 = shalt.err (!%p3682_p1)
}
  0x22   :  { %34 = dma.hbm_to_vmem [thread:$0]  %s4088_s2, 256, %s32_s27, [#allocation10]  }
  0x23   :  { %3708 = dma.done.wait [#allocation7], 34816  }
  0x24   :  { %3709 = vsyncadd [#allocation7], 4294932480 }
  0x25   :  { %3710 = dma.done.wait [#allocation10], 256  }
  0x26   :  { %3711 = vsyncadd [#allocation10], 4294967040  ;;  %v3718_v0 = vmov 0   ;;  %v3340_v1 = vld [vmem:[#allocation6 + $0x4] ss:$8 sps:$4 sm:$0xff]   ;;  %v3771_v35 = vld [vmem:[%s4086_s0] sm:$0xff]  }
  0x27   :  { %203 = vmatprep.mubr.bf16.mxu0 %v3718_v0  ;;  %372 = vmatprep.mubr.bf16.mxu1 %v3718_v0  ;;  %v3342_v2 = vld [vmem:[#allocation6 + $0x84] ss:$8 sps:$4 sm:$0xff]   ;;  %v3344_v3 = vld [vmem:[#allocation6] ss:$8 sps:$4 sm:$0xff]   ;;  %v3346_v5 = vld [vmem:[#allocation6 + $0x14] ss:$8 sps:$4 sm:$0xff]  }
  0x28   :  { %171 = vmatprep.subr.bf16.mxu0 %v3340_v1  ;;  %v3345_v4 = vld [vmem:[#allocation6 + $0x80] ss:$8 sps:$4 sm:$0xff]   ;;  %340 = vmatprep.subr.bf16.mxu1 %v3342_v2  ;;  %v3348_v6 = vld [vmem:[#allocation6 + $0x94] ss:$8 sps:$4 sm:$0xff]   ;;  %v3350_v7 = vld [vmem:[#allocation6 + $0x10] ss:$8 sps:$4 sm:$0xff]  }
  0x29   :  { %172 = vmatpush1.bf16.msra.mxu0 %v3344_v3  ;;  %341 = vmatpush1.bf16.msra.mxu1 %v3345_v4  ;;  %v3351_v8 = vld [vmem:[#allocation6 + $0x90] ss:$8 sps:$4 sm:$0xff]   ;;  %v3352_v9 = vld [vmem:[#allocation6 + $0x24] ss:$8 sps:$4 sm:$0xff]   ;;  %v3356_v11 = vld [vmem:[#allocation6 + $0x20] ss:$8 sps:$4 sm:$0xff]  }
  0x2a   :  { %173 = vmatprep.subr.bf16.mxu0 %v3346_v5  ;;  %342 = vmatprep.subr.bf16.mxu1 %v3348_v6  ;;  %v3354_v10 = vld [vmem:[#allocation6 + $0xa4] ss:$8 sps:$4 sm:$0xff]   ;;  %v3357_v12 = vld [vmem:[#allocation6 + $0xa0] ss:$8 sps:$4 sm:$0xff]   ;;  %v3358_v13 = vld [vmem:[#allocation6 + $0x34] ss:$8 sps:$4 sm:$0xff]  }
  0x2b   :  { %v3360_v14 = vld [vmem:[#allocation6 + $0xb4] ss:$8 sps:$4 sm:$0xff]   ;;  %v3362_v15 = vld [vmem:[#allocation6 + $0x30] ss:$8 sps:$4 sm:$0xff]   ;;  %v3364_v17 = vld [vmem:[#allocation6 + $0x44] ss:$8 sps:$4 sm:$0xff]  }
  0x2c   :  { %v3363_v16 = vld [vmem:[#allocation6 + $0xb0] ss:$8 sps:$4 sm:$0xff]   ;;  %v3366_v18 = vld [vmem:[#allocation6 + $0xc4] ss:$8 sps:$4 sm:$0xff]   ;;  %v3368_v19 = vld [vmem:[#allocation6 + $0x40] ss:$8 sps:$4 sm:$0xff]  }
  0x2d   :  { %174 = vmatpush1.bf16.msra.mxu0 %v3350_v7  ;;  %343 = vmatpush1.bf16.msra.mxu1 %v3351_v8  ;;  %v3369_v20 = vld [vmem:[#allocation6 + $0xc0] ss:$8 sps:$4 sm:$0xff]   ;;  %v3370_v21 = vld [vmem:[#allocation6 + $0x54] ss:$8 sps:$4 sm:$0xff]   ;;  %v3374_v23 = vld [vmem:[#allocation6 + $0x50] ss:$8 sps:$4 sm:$0xff]  }
  0x2e   :  { %175 = vmatprep.subr.bf16.mxu0 %v3352_v9  ;;  %344 = vmatprep.subr.bf16.mxu1 %v3354_v10  ;;  %v3372_v22 = vld [vmem:[#allocation6 + $0xd4] ss:$8 sps:$4 sm:$0xff]   ;;  %v3375_v24 = vld [vmem:[#allocation6 + $0xd0] ss:$8 sps:$4 sm:$0xff]   ;;  %v3376_v25 = vld [vmem:[#allocation6 + $0x64] ss:$8 sps:$4 sm:$0xff]  }
  0x2f   :  { %v3378_v26 = vld [vmem:[#allocation6 + $0xe4] ss:$8 sps:$4 sm:$0xff]   ;;  %v3380_v27 = vld [vmem:[#allocation6 + $0x60] ss:$8 sps:$4 sm:$0xff]   ;;  %v3382_v29 = vld [vmem:[#allocation6 + $0x74] ss:$8 sps:$4 sm:$0xff]  }
  0x30   :  { %v3381_v28 = vld [vmem:[#allocation6 + $0xe0] ss:$8 sps:$4 sm:$0xff]   ;;  %v3384_v30 = vld [vmem:[#allocation6 + $0xf4] ss:$8 sps:$4 sm:$0xff]   ;;  %v3386_v31 = vld [vmem:[#allocation6 + $0x70] ss:$8 sps:$4 sm:$0xff]  }
  0x31   :  { %176 = vmatpush1.bf16.msra.mxu0 %v3356_v11  ;;  %345 = vmatpush1.bf16.msra.mxu1 %v3357_v12  ;;  %v3387_v32 = vld [vmem:[#allocation6 + $0xf0] ss:$8 sps:$4 sm:$0xff]   ;;  %v3391_v33 = vld [vmem:[#allocation6 + $0x104] ss:$8 sps:$4 sm:$0xff]   ;;  %v3389_v36 = vld [vmem:[#allocation6 + $0x100] ss:$8 sps:$4 sm:$0xff]  }
  0x32   :  { %177 = vmatprep.subr.bf16.mxu0 %v3358_v13  ;;  %346 = vmatprep.subr.bf16.mxu1 %v3360_v14  ;;  %v3394_v34 = vld [vmem:[#allocation6 + $0x184] ss:$8 sps:$4 sm:$0xff]   ;;  %v3392_v37 = vld [vmem:[#allocation6 + $0x180] ss:$8 sps:$4 sm:$0xff]   ;;  %v3397_v38 = vld [vmem:[#allocation6 + $0x114] ss:$8 sps:$4 sm:$0xff]  }
  0x33   :  { %v3400_v39 = vld [vmem:[#allocation6 + $0x194] ss:$8 sps:$4 sm:$0xff]   ;;  %v3395_v40 = vld [vmem:[#allocation6 + $0x110] ss:$8 sps:$4 sm:$0xff]   ;;  %v3404_v42 = vld [vmem:[#allocation6 + $0x124] ss:$8 sps:$4 sm:$0xff]  }
  0x34   :  { %v3398_v41 = vld [vmem:[#allocation6 + $0x190] ss:$8 sps:$4 sm:$0xff]   ;;  %v3407_v43 = vld [vmem:[#allocation6 + $0x1a4] ss:$8 sps:$4 sm:$0xff]   ;;  %v3402_v45 = vld [vmem:[#allocation6 + $0x120] ss:$8 sps:$4 sm:$0xff]  }
  0x35   :  { %178 = vmatpush1.bf16.msra.mxu0 %v3362_v15  ;;  %347 = vmatpush1.bf16.msra.mxu1 %v3363_v16  ;;  %v3780_v44 = vld [vmem:[%s4086_s0 + $0x8] sm:$0xff]   ;;  %v3405_v46 = vld [vmem:[#allocation6 + $0x1a0] ss:$8 sps:$4 sm:$0xff]   ;;  %v3417_v51 = vld [vmem:[#allocation6 + $0x144] ss:$8 sps:$4 sm:$0xff]   ;;  %vm421_vm0 = vcmask 1046528  }
  0x36   :  { %179 = vmatprep.subr.bf16.mxu0 %v3364_v17  ;;  %348 = vmatprep.subr.bf16.mxu1 %v3366_v18  ;;  %v3410_v47 = vld [vmem:[#allocation6 + $0x134] ss:$8 sps:$4 sm:$0xff]   ;;  %v3408_v49 = vld [vmem:[#allocation6 + $0x130] ss:$8 sps:$4 sm:$0xff]   ;;  %v3420_v52 = vld [vmem:[#allocation6 + $0x1c4] ss:$8 sps:$4 sm:$0xff]  }
  0x37   :  { %v3413_v48 = vld [vmem:[#allocation6 + $0x1b4] ss:$8 sps:$4 sm:$0xff]   ;;  %v3411_v50 = vld [vmem:[#allocation6 + $0x1b0] ss:$8 sps:$4 sm:$0xff]   ;;  %v3789_v53 = vld [vmem:[%s4086_s0 + $0x10] sm:$0xff]   ;;  %vm667_vm1 = vcmask 1045504  }
  0x38   :  { %v3415_v54 = vld [vmem:[#allocation6 + $0x140] ss:$8 sps:$4 sm:$0xff]   ;;  %v3423_v56 = vld [vmem:[#allocation6 + $0x154] ss:$8 sps:$4 sm:$0xff]   ;;  %v3421_v58 = vld [vmem:[#allocation6 + $0x150] ss:$8 sps:$4 sm:$0xff]  }
  0x39   :  { %180 = vmatpush1.bf16.msra.mxu0 %v3368_v19  ;;  %349 = vmatpush1.bf16.msra.mxu1 %v3369_v20  ;;  %v3418_v55 = vld [vmem:[#allocation6 + $0x1c0] ss:$8 sps:$4 sm:$0xff]   ;;  %v3426_v57 = vld [vmem:[#allocation6 + $0x1d4] ss:$8 sps:$4 sm:$0xff]   ;;  %v3424_v59 = vld [vmem:[#allocation6 + $0x1d0] ss:$8 sps:$4 sm:$0xff]  }
  0x3a   :  { %181 = vmatprep.subr.bf16.mxu0 %v3370_v21  ;;  %350 = vmatprep.subr.bf16.mxu1 %v3372_v22  ;;  %v3430_v60 = vld [vmem:[#allocation6 + $0x164] ss:$8 sps:$4 sm:$0xff]   ;;  %v3428_v63 = vld [vmem:[#allocation6 + $0x160] ss:$8 sps:$4 sm:$0xff]   ;;  %v3436_v2 = vld [vmem:[#allocation6 + $0x174] ss:$8 sps:$4 sm:$0xff]  }
  0x3b   :  { %v3433_v61 = vld [vmem:[#allocation6 + $0x1e4] ss:$8 sps:$4 sm:$0xff]   ;;  %v3431_v1 = vld [vmem:[#allocation6 + $0x1e0] ss:$8 sps:$4 sm:$0xff]   ;;  %v3439_v3 = vld [vmem:[#allocation6 + $0x1f4] ss:$8 sps:$4 sm:$0xff]  }
  0x3c   :  { %v3798_v62 = vld [vmem:[%s4086_s0 + $0x18] sm:$0xff]   ;;  %v3434_v4 = vld [vmem:[#allocation6 + $0x170] ss:$8 sps:$4 sm:$0xff]   ;;  %v3445_v8 = vld [vmem:[#allocation6 + $0x214] ss:$8 sps:$4 sm:$0xff]   ;;  %vm913_vm2 = vcmask 1044480  }
  0x3d   :  { %182 = vmatpush1.bf16.msra.mxu0 %v3374_v23  ;;  %351 = vmatpush1.bf16.msra.mxu1 %v3375_v24  ;;  %v3437_v5 = vld [vmem:[#allocation6 + $0x1f0] ss:$8 sps:$4 sm:$0xff]   ;;  %v3442_v6 = vld [vmem:[#allocation6 + $0x204] ss:$8 sps:$4 sm:$0xff]   ;;  %v3440_v7 = vld [vmem:[#allocation6 + $0x200] ss:$8 sps:$4 sm:$0xff]  }
  0x3e   :  { %183 = vmatprep.subr.bf16.mxu0 %v3376_v25  ;;  %352 = vmatprep.subr.bf16.mxu1 %v3378_v26  ;;  %v3443_v9 = vld [vmem:[#allocation6 + $0x210] ss:$8 sps:$4 sm:$0xff]   ;;  %v3448_v10 = vld [vmem:[#allocation6 + $0x224] ss:$8 sps:$4 sm:$0xff]   ;;  %v3446_v11 = vld [vmem:[#allocation6 + $0x220] ss:$8 sps:$4 sm:$0xff]  }
  0x3f   :  { %v3451_v12 = vld [vmem:[#allocation6 + $0x234] ss:$8 sps:$4 sm:$0xff]   ;;  %v3449_v13 = vld [vmem:[#allocation6 + $0x230] ss:$8 sps:$4 sm:$0xff]   ;;  %v3454_v14 = vld [vmem:[#allocation6 + $0x244] ss:$8 sps:$4 sm:$0xff]  }
  0x40   :  { %v3452_v15 = vld [vmem:[#allocation6 + $0x240] ss:$8 sps:$4 sm:$0xff]   ;;  %v3457_v16 = vld [vmem:[#allocation6 + $0x254] ss:$8 sps:$4 sm:$0xff]   ;;  %v3455_v17 = vld [vmem:[#allocation6 + $0x250] ss:$8 sps:$4 sm:$0xff]  }
  0x41   :  { %184 = vmatpush1.bf16.msra.mxu0 %v3380_v27  ;;  %353 = vmatpush1.bf16.msra.mxu1 %v3381_v28  ;;  %v3460_v18 = vld [vmem:[#allocation6 + $0x264] ss:$8 sps:$4 sm:$0xff]   ;;  %v3458_v19 = vld [vmem:[#allocation6 + $0x260] ss:$8 sps:$4 sm:$0xff]   ;;  %v3463_v20 = vld [vmem:[#allocation6 + $0x274] ss:$8 sps:$4 sm:$0xff]  }
  0x42   :  { %185 = vmatprep.subr.bf16.mxu0 %v3382_v29  ;;  %354 = vmatprep.subr.bf16.mxu1 %v3384_v30  ;;  %v3461_v21 = vld [vmem:[#allocation6 + $0x270] ss:$8 sps:$4 sm:$0xff]   ;;  %v3466_v22 = vld [vmem:[#allocation6 + $0x284] ss:$8 sps:$4 sm:$0xff]   ;;  %v3464_v24 = vld [vmem:[#allocation6 + $0x280] ss:$8 sps:$4 sm:$0xff]  }
  0x43   :  { %v3469_v23 = vld [vmem:[#allocation6 + $0x304] ss:$8 sps:$4 sm:$0xff]   ;;  %v3467_v25 = vld [vmem:[#allocation6 + $0x300] ss:$8 sps:$4 sm:$0xff]   ;;  %v3472_v26 = vld [vmem:[#allocation6 + $0x294] ss:$8 sps:$4 sm:$0xff]  }
  0x44   :  { %v3475_v27 = vld [vmem:[#allocation6 + $0x314] ss:$8 sps:$4 sm:$0xff]   ;;  %v3470_v28 = vld [vmem:[#allocation6 + $0x290] ss:$8 sps:$4 sm:$0xff]   ;;  %v3478_v30 = vld [vmem:[#allocation6 + $0x2a4] ss:$8 sps:$4 sm:$0xff]  }
  0x45   :  { %186 = vmatpush1.bf16.msra.mxu0 %v3386_v31  ;;  %355 = vmatpush1.bf16.msra.mxu1 %v3387_v32  ;;  %v3473_v29 = vld [vmem:[#allocation6 + $0x310] ss:$8 sps:$4 sm:$0xff]   ;;  %v3481_v31 = vld [vmem:[#allocation6 + $0x324] ss:$8 sps:$4 sm:$0xff]   ;;  %v3476_v32 = vld [vmem:[#allocation6 + $0x2a0] ss:$8 sps:$4 sm:$0xff]  }
  0x46   :  { %586 = vmatprep.subr.bf16.mxu0 %v3391_v33  ;;  %832 = vmatprep.subr.bf16.mxu1 %v3394_v34  ;;  %v3479_v33 = vld [vmem:[#allocation6 + $0x320] ss:$8 sps:$4 sm:$0xff]   ;;  %v3484_v34 = vld [vmem:[#allocation6 + $0x2b4] ss:$8 sps:$4 sm:$0xff]   ;;  %vm1159_vm3 = vcmask 1043456   ;;  %vm3720_vm4 = vmmov 0  }
  0x47   :  { %s3721_s0 = smov [#allocation11]   ;;  %vm2948_vm5 = vcmask 74752  }
  0x48   :  { %204 = vmatmul.mubr.bf16.vlgmr.msra.gmra.mrb[0].mxu0 %v3771_v35  ;;  %373 = vmatmul.mubr.bf16.vlgmr.msra.gmra.mrb[0].mxu1 %v3771_v35  ;;  %s2956_s17 = sshll.u32 %s3721_s0, 4  ;;  %s2957_s17 = int_to_ptr.vmem [resolvable:$true] %s2956_s17 }
  0x49   :  { %587 = vmatpush1.bf16.msra.mxu0 %v3389_v36  ;;  %833 = vmatpush1.bf16.msra.mxu1 %v3392_v37  ;;  %v3482_v36 = vld [vmem:[#allocation6 + $0x2b0] ss:$8 sps:$4 sm:$0xff]   ;;  %s3686_s18 = scalar_lea.vmem %s2957_s17, 32  ;;  %p3691_p3 = scmp.lt.s32.totalorder %s2957_s17, %s2957_s17 }
  0x4a   :  { %588 = vmatprep.subr.bf16.mxu0 %v3397_v38  ;;  %834 = vmatprep.subr.bf16.mxu1 %v3400_v39  ;;  %v3485_v37 = vld [vmem:[#allocation6 + $0x330] ss:$8 sps:$4 sm:$0xff]   ;;  %v3490_v38 = vld [vmem:[#allocation6 + $0x2c4] ss:$8 sps:$4 sm:$0xff]   ;;  %p3687_p2 = scmp.ne.s32.totalorder %s2957_s17, %s3686_s18  ;;  %p3692_p4 = scmp.lt.s32.totalorder %s3686_s18, %s3686_s18 }
  0x4b   :  { %213 = vmatprep.mubr.bf16.mxu0 %v3718_v0  ;;  %382 = vmatprep.mubr.bf16.mxu1 %v3718_v0  ;;  %v3493_v39 = vld [vmem:[#allocation6 + $0x344] ss:$8 sps:$4 sm:$0xff]  }
  0x4c   :  { %p3693_p5 = por %p3692_p4, %p3691_p3 }
  0x4d   :  { %589 = vmatpush1.bf16.msra.mxu0 %v3395_v40  ;;  %835 = vmatpush1.bf16.msra.mxu1 %v3398_v41  ;;  %v3488_v40 = vld [vmem:[#allocation6 + $0x2c0] ss:$8 sps:$4 sm:$0xff]  }
  0x4e   :  { %590 = vmatprep.subr.bf16.mxu0 %v3404_v42  ;;  %836 = vmatprep.subr.bf16.mxu1 %v3407_v43  ;;  %v3491_v41 = vld [vmem:[#allocation6 + $0x340] ss:$8 sps:$4 sm:$0xff]   ;;  %v3496_v42 = vld [vmem:[#allocation6 + $0x2d4] ss:$8 sps:$4 sm:$0xff]   ;;  %p3694_p6 = pnand %p3693_p5, %p3687_p2 }
  0x4f   :  { %v3499_v43 = vld [vmem:[#allocation6 + $0x354] ss:$8 sps:$4 sm:$0xff]  }
  0x50   :  { %214 = vmatmul.mubr.bf16.gmra.mrb[4].mxu0 %v3780_v44  ;;  %383 = vmatmul.mubr.bf16.gmra.mrb[4].mxu1 %v3780_v44 }
  0x51   :  { %591 = vmatpush1.bf16.msra.mxu0 %v3402_v45  ;;  %837 = vmatpush1.bf16.msra.mxu1 %v3405_v46  ;;  %v3497_v45 = vld [vmem:[#allocation6 + $0x350] ss:$8 sps:$4 sm:$0xff]   ;;  %v3502_v46 = vld [vmem:[#allocation6 + $0x2e4] ss:$8 sps:$4 sm:$0xff]  }
  0x52   :  { %592 = vmatprep.subr.bf16.mxu0 %v3410_v47  ;;  %838 = vmatprep.subr.bf16.mxu1 %v3413_v48  ;;  %v3505_v47 = vld [vmem:[#allocation6 + $0x364] ss:$8 sps:$4 sm:$0xff]   ;;  %v3500_v48 = vld [vmem:[#allocation6 + $0x2e0] ss:$8 sps:$4 sm:$0xff]  }
  0x53   :  { %223 = vmatprep.mubr.bf16.mxu0 %v3718_v0  ;;  %392 = vmatprep.mubr.bf16.mxu1 %v3718_v0 }
  0x55   :  { %593 = vmatpush1.bf16.msra.mxu0 %v3408_v49  ;;  %839 = vmatpush1.bf16.msra.mxu1 %v3411_v50  ;;  %v3503_v49 = vld [vmem:[#allocation6 + $0x360] ss:$8 sps:$4 sm:$0xff]   ;;  %v3508_v50 = vld [vmem:[#allocation6 + $0x2f4] ss:$8 sps:$4 sm:$0xff]  }
  0x56   :  { %594 = vmatprep.subr.bf16.mxu0 %v3417_v51  ;;  %840 = vmatprep.subr.bf16.mxu1 %v3420_v52  ;;  %v3511_v51 = vld [vmem:[#allocation6 + $0x374] ss:$8 sps:$4 sm:$0xff]   ;;  %v3506_v52 = vld [vmem:[#allocation6 + $0x2f0] ss:$8 sps:$4 sm:$0xff]  }
  0x58   :  { %224 = vmatmul.mubr.bf16.gmra.mrb[8].mxu0 %v3789_v53  ;;  %393 = vmatmul.mubr.bf16.gmra.mrb[8].mxu1 %v3789_v53 }
  0x59   :  { %595 = vmatpush1.bf16.msra.mxu0 %v3415_v54  ;;  %841 = vmatpush1.bf16.msra.mxu1 %v3418_v55  ;;  %v3514_v54 = vld [vmem:[#allocation6 + $0x384] ss:$8 sps:$4 sm:$0xff]  }
  0x5a   :  { %596 = vmatprep.subr.bf16.mxu0 %v3423_v56  ;;  %842 = vmatprep.subr.bf16.mxu1 %v3426_v57  ;;  %v3517_v55 = vld [vmem:[#allocation6 + $0x404] ss:$8 sps:$4 sm:$0xff]  }
  0x5b   :  { %233 = vmatprep.mubr.bf16.mxu0 %v3718_v0  ;;  %402 = vmatprep.mubr.bf16.mxu1 %v3718_v0 }
  0x5d   :  { %597 = vmatpush1.bf16.msra.mxu0 %v3421_v58  ;;  %843 = vmatpush1.bf16.msra.mxu1 %v3424_v59 }
  0x5e   :  { %598 = vmatprep.subr.bf16.mxu0 %v3430_v60  ;;  %844 = vmatprep.subr.bf16.mxu1 %v3433_v61 }
  0x60   :  { %234 = vmatmul.mubr.bf16.gmra.mrb[12].mxu0 %v3798_v62  ;;  %403 = vmatmul.mubr.bf16.gmra.mrb[12].mxu1 %v3798_v62 }
  0x61   :  { %599 = vmatpush1.bf16.msra.mxu0 %v3428_v63  ;;  %845 = vmatpush1.bf16.msra.mxu1 %v3431_v1 }
  0x62   :  { %600 = vmatprep.subr.bf16.mxu0 %v3436_v2  ;;  %846 = vmatprep.subr.bf16.mxu1 %v3439_v3 }
  0x63   :  { %618 = vmatprep.mubr.bf16.mxu0 %v3718_v0  ;;  %864 = vmatprep.mubr.bf16.mxu1 %v3718_v0 }
  0x65   :  { %601 = vmatpush1.bf16.msra.mxu0 %v3434_v4  ;;  %847 = vmatpush1.bf16.msra.mxu1 %v3437_v5 }
  0x66   :  { %1078 = vmatprep.subr.bf16.mxu0 %v3442_v6  ;;  %1440 = vmatprep.subr.bf16.mxu1 %v3466_v22 }
  0x68   :  { %619 = vmatmul.mubr.bf16.vlgmr.msra.gmra.mrb[16].mxu0 %v3771_v35  ;;  %865 = vmatmul.mubr.bf16.vlgmr.msra.gmra.mrb[16].mxu1 %v3771_v35 }
  0x69   :  { %1079 = vmatpush1.bf16.msra.mxu0 %v3440_v7  ;;  %628 = vmatprep.mubr.bf16.mxu0 %v3718_v0 }
  0x6a   :  { %1080 = vmatprep.subr.bf16.mxu0 %v3445_v8  ;;  %874 = vmatprep.mubr.bf16.mxu1 %v3718_v0 }
  0x6b   :  { %1441 = vmatpush1.bf16.msra.mxu1 %v3464_v24 }
  0x6c   :  { %1442 = vmatprep.subr.bf16.mxu1 %v3472_v26 }
  0x6d   :  { %1081 = vmatpush1.bf16.msra.mxu0 %v3443_v9 }
  0x6e   :  { %1082 = vmatprep.subr.bf16.mxu0 %v3448_v10 }
  0x6f   :  { %1443 = vmatpush1.bf16.msra.mxu1 %v3470_v28 }
  0x70   :  { %629 = vmatmul.mubr.bf16.gmra.mrb[20].mxu0 %v3780_v44  ;;  %875 = vmatmul.mubr.bf16.gmra.mrb[20].mxu1 %v3780_v44 }
  0x71   :  { %1083 = vmatpush1.bf16.msra.mxu0 %v3446_v11  ;;  %638 = vmatprep.mubr.bf16.mxu0 %v3718_v0 }
  0x72   :  { %1084 = vmatprep.subr.bf16.mxu0 %v3451_v12  ;;  %884 = vmatprep.mubr.bf16.mxu1 %v3718_v0 }
  0x73   :  { %1444 = vmatprep.subr.bf16.mxu1 %v3478_v30 }
  0x74   :  { %1445 = vmatpush1.bf16.msra.mxu1 %v3476_v32 }
  0x75   :  { %1085 = vmatpush1.bf16.msra.mxu0 %v3449_v13  ;;  %1446 = vmatprep.subr.bf16.mxu1 %v3484_v34 }
  0x76   :  { %1086 = vmatprep.subr.bf16.mxu0 %v3454_v14 }
  0x78   :  { %639 = vmatmul.mubr.bf16.gmra.mrb[24].mxu0 %v3789_v53  ;;  %885 = vmatmul.mubr.bf16.gmra.mrb[24].mxu1 %v3789_v53 }
  0x79   :  { %1087 = vmatpush1.bf16.msra.mxu0 %v3452_v15  ;;  %648 = vmatprep.mubr.bf16.mxu0 %v3718_v0 }
  0x7a   :  { %1088 = vmatprep.subr.bf16.mxu0 %v3457_v16  ;;  %894 = vmatprep.mubr.bf16.mxu1 %v3718_v0 }
  0x7b   :  { %1447 = vmatpush1.bf16.msra.mxu1 %v3482_v36 }
  0x7c   :  { %1448 = vmatprep.subr.bf16.mxu1 %v3490_v38 }
  0x7d   :  { %1089 = vmatpush1.bf16.msra.mxu0 %v3455_v17 }
  0x7e   :  { %1090 = vmatprep.subr.bf16.mxu0 %v3460_v18 }
  0x7f   :  { %1449 = vmatpush1.bf16.msra.mxu1 %v3488_v40 }
  0x80   :  { %649 = vmatmul.mubr.bf16.gmra.mrb[28].mxu0 %v3798_v62  ;;  %895 = vmatmul.mubr.bf16.gmra.mrb[28].mxu1 %v3798_v62 }
  0x81   :  { %1091 = vmatpush1.bf16.msra.mxu0 %v3458_v19  ;;  %1110 = vmatprep.mubr.bf16.mxu0 %v3718_v0 }
  0x82   :  { %1092 = vmatprep.subr.bf16.mxu0 %v3463_v20  ;;  %1472 = vmatprep.mubr.bf16.mxu1 %v3718_v0 }
  0x83   :  { %1450 = vmatprep.subr.bf16.mxu1 %v3496_v42 }
  0x85   :  { %1093 = vmatpush1.bf16.msra.mxu0 %v3461_v21 }
  0x86   :  { %1587 = vmatprep.subr.bf16.mxu0 %v3469_v23 }
  0x88   :  { %1111 = vmatmul.mubr.bf16.vlgmr.msra.gmra.mrb[32].mxu0 %v3771_v35  ;;  %v3487_v35 = vld [vmem:[#allocation6 + $0x334] ss:$8 sps:$4 sm:$0xff]  }
  0x89   :  { %1120 = vmatprep.mubr.bf16.mxu0 %v3718_v0  ;;  %1588 = vmatpush1.bf16.msra.mxu0 %v3467_v25 }
  0x8a   :  { %1589 = vmatprep.subr.bf16.mxu0 %v3475_v27 }
  0x8d   :  { %1590 = vmatpush1.bf16.msra.mxu0 %v3473_v29 }
  0x8e   :  { %1591 = vmatprep.subr.bf16.mxu0 %v3481_v31 }
  0x90   :  { %1121 = vmatmul.mubr.bf16.gmra.mrb[36].mxu0 %v3780_v44  ;;  %v3494_v44 = vld [vmem:[#allocation6 + $0x2d0] ss:$8 sps:$4 sm:$0xff]  }
  0x91   :  { %1130 = vmatprep.mubr.bf16.mxu0 %v3718_v0  ;;  %1592 = vmatpush1.bf16.msra.mxu0 %v3479_v33 }
  0x92   :  { %1593 = vmatprep.subr.bf16.mxu0 %v3487_v35  ;;  %1451 = vmatpush1.bf16.msra.mxu1 %v3494_v44 }
  0x93   :  { %1452 = vmatprep.subr.bf16.mxu1 %v3502_v46 }
  0x95   :  { %1594 = vmatpush1.bf16.msra.mxu0 %v3485_v37 }
  0x96   :  { %1595 = vmatprep.subr.bf16.mxu0 %v3493_v39  ;;  %1453 = vmatpush1.bf16.msra.mxu1 %v3500_v48 }
  0x97   :  { %1454 = vmatprep.subr.bf16.mxu1 %v3508_v50 }
  0x98   :  { %1131 = vmatmul.mubr.bf16.gmra.mrb[40].mxu0 %v3789_v53  ;;  %v3509_v53 = vld [vmem:[#allocation6 + $0x370] ss:$8 sps:$4 sm:$0xff]  }
  0x99   :  { %1140 = vmatprep.mubr.bf16.mxu0 %v3718_v0  ;;  %1596 = vmatpush1.bf16.msra.mxu0 %v3491_v41 }
  0x9a   :  { %1597 = vmatprep.subr.bf16.mxu0 %v3499_v43  ;;  %1455 = vmatpush1.bf16.msra.mxu1 %v3506_v52 }
  0x9b   :  { %1774 = vmatprep.subr.bf16.mxu1 %v3514_v54 }
  0x9d   :  { %1598 = vmatpush1.bf16.msra.mxu0 %v3497_v45 }
  0x9e   :  { %1599 = vmatprep.subr.bf16.mxu0 %v3505_v47 }
  0xa0   :  { %1141 = vmatmul.mubr.bf16.gmra.mrb[44].mxu0 %v3798_v62 }
  0xa1   :  { %1619 = vmatprep.mubr.bf16.mxu0 %v3718_v0  ;;  %1600 = vmatpush1.bf16.msra.mxu0 %v3503_v49 }
  0xa2   :  { %1601 = vmatprep.subr.bf16.mxu0 %v3511_v51 }
  0xa5   :  { %1602 = vmatpush1.bf16.msra.mxu0 %v3509_v53 }
  0xa6   :  { %1959 = vmatprep.subr.bf16.mxu0 %v3517_v55 }
 0x11b   :  { %v205_v56 = vpop.f32.mrb[0].mxu0  ;;  %v374_v57 = vpop.f32.mrb[0].mxu1 }
 0x11c   :  { %v422_v58 = vrot.slane %v374_v57, 1  ;;  %v207_v59 = vpop.f32.mrb[1].mxu0  ;;  %v376_v60 = vpop.f32.mrb[1].mxu1 }
 0x11d   :  { %v425_v61 = vrot.slane %v376_v60, 1  ;;  %v209_v62 = vpop.f32.mrb[2].mxu0  ;;  %v378_v63 = vpop.f32.mrb[2].mxu1 }
 0x11e   :  { %v423_v1 = vrot.slane %v378_v63, 1  ;;  %v211_v2 = vpop.f32.mrb[3].mxu0  ;;  %v380_v3 = vpop.f32.mrb[3].mxu1 }
 0x11f   :  { %v426_v4 = vrot.slane %v380_v3, 1 }
 0x120   :  { %v424_v5 = vsel %vm421_vm0, %v422_v58, %v423_v1 }
 0x121   :  { %v3829_v6 = vadd.f32 %v424_v5, %v205_v56  ;;  %v427_v7 = vsel %vm421_vm0, %v425_v61, %v426_v4 }
 0x122   :  { %v3832_v8 = vadd.f32 %v427_v7, %v207_v59 }
 0x123   :  { %v215_v9 = vpop.f32.mrb[4].mxu0  ;;  %v384_v10 = vpop.f32.mrb[4].mxu1 }
 0x124   :  { %v428_v11 = vrot.slane %v384_v10, 1  ;;  %v217_v12 = vpop.f32.mrb[5].mxu0  ;;  %v386_v13 = vpop.f32.mrb[5].mxu1 }
 0x125   :  { %v430_v14 = vrot.slane %v386_v13, 1  ;;  %v219_v15 = vpop.f32.mrb[6].mxu0  ;;  %v388_v16 = vpop.f32.mrb[6].mxu1 }
 0x126   :  { %v429_v17 = vsel %vm421_vm0, %v423_v1, %v428_v11  ;;  %v432_v18 = vrot.slane %v388_v16, 1  ;;  %v221_v19 = vpop.f32.mrb[7].mxu0  ;;  %v390_v20 = vpop.f32.mrb[7].mxu1 }
 0x127   :  { %v3835_v21 = vadd.f32 %v429_v17, %v209_v62  ;;  %v431_v22 = vsel %vm421_vm0, %v426_v4, %v430_v14  ;;  %v434_v23 = vrot.slane %v390_v20, 1 }
 0x128   :  { %v3838_v24 = vadd.f32 %v431_v22, %v211_v2  ;;  %v433_v25 = vsel %vm421_vm0, %v428_v11, %v432_v18  ;;  %v3841_v26 = vadd.f32 %v432_v18, %v219_v15 }
 0x129   :  { %v3843_v27 = vadd.f32 %v433_v25, %v215_v9  ;;  %v435_v28 = vsel %vm421_vm0, %v430_v14, %v434_v23  ;;  %v3846_v29 = vadd.f32 %v434_v23, %v221_v19 }
 0x12a   :  { %v3848_v30 = vadd.f32 %v435_v28, %v217_v12 }
 0x12b   :  { %v225_v31 = vpop.f32.mrb[8].mxu0  ;;  %v394_v32 = vpop.f32.mrb[8].mxu1 }
 0x12c   :  { %v460_v33 = vrot.slane %v394_v32, 1  ;;  %v227_v34 = vpop.f32.mrb[9].mxu0  ;;  %v396_v35 = vpop.f32.mrb[9].mxu1 }
 0x12d   :  { %v463_v36 = vrot.slane %v396_v35, 1  ;;  %v229_v37 = vpop.f32.mrb[10].mxu0  ;;  %v398_v38 = vpop.f32.mrb[10].mxu1 }
 0x12e   :  { %v461_v39 = vrot.slane %v398_v38, 1  ;;  %v231_v40 = vpop.f32.mrb[11].mxu0  ;;  %v400_v41 = vpop.f32.mrb[11].mxu1 }
 0x12f   :  { %v464_v42 = vrot.slane %v400_v41, 1 }
 0x130   :  { %v462_v43 = vsel %vm421_vm0, %v460_v33, %v461_v39 }
 0x131   :  { %v3851_v44 = vadd.f32 %v462_v43, %v225_v31  ;;  %v465_v45 = vsel %vm421_vm0, %v463_v36, %v464_v42 }
 0x132   :  { %v3854_v46 = vadd.f32 %v465_v45, %v227_v34 }
 0x133   :  { %v235_v47 = vpop.f32.mrb[12].mxu0  ;;  %v404_v48 = vpop.f32.mrb[12].mxu1 }
 0x134   :  { %v466_v49 = vrot.slane %v404_v48, 1  ;;  %v237_v50 = vpop.f32.mrb[13].mxu0  ;;  %v406_v51 = vpop.f32.mrb[13].mxu1 }
 0x135   :  { %v468_v52 = vrot.slane %v406_v51, 1  ;;  %v239_v53 = vpop.f32.mrb[14].mxu0  ;;  %v408_v54 = vpop.f32.mrb[14].mxu1 }
 0x136   :  { %v467_v55 = vsel %vm421_vm0, %v461_v39, %v466_v49  ;;  %v470_v56 = vrot.slane %v408_v54, 1  ;;  %v241_v57 = vpop.f32.mrb[15].mxu0  ;;  %v410_v58 = vpop.f32.mrb[15].mxu1 }
 0x137   :  { %v3857_v59 = vadd.f32 %v467_v55, %v229_v37  ;;  %v469_v60 = vsel %vm421_vm0, %v464_v42, %v468_v52  ;;  %v472_v61 = vrot.slane %v410_v58, 1 }
 0x138   :  { %v3860_v62 = vadd.f32 %v469_v60, %v231_v40  ;;  %v471_v63 = vsel %vm421_vm0, %v466_v49, %v470_v56  ;;  %v3863_v1 = vadd.f32 %v470_v56, %v239_v53 }
 0x139   :  { %v3865_v2 = vadd.f32 %v471_v63, %v235_v47  ;;  %v473_v3 = vsel %vm421_vm0, %v468_v52, %v472_v61  ;;  %v3868_v4 = vadd.f32 %v472_v61, %v241_v57 }
 0x13a   :  { %v3870_v5 = vadd.f32 %v473_v3, %v237_v50 }
 0x13b   :  { %v620_v7 = vpop.f32.mrb[16].mxu0  ;;  %v866_v9 = vpop.f32.mrb[16].mxu1 }
 0x13c   :  { %v622_v10 = vpop.f32.mrb[17].mxu0  ;;  %v914_v11 = vrot.slane %v866_v9, 3  ;;  %v868_v12 = vpop.f32.mrb[17].mxu1  ;;  %v668_v16 = vrot.slane %v620_v7, 2 }
 0x13d   :  { %v624_v13 = vpop.f32.mrb[18].mxu0  ;;  %v917_v14 = vrot.slane %v868_v12, 3  ;;  %v870_v15 = vpop.f32.mrb[18].mxu1  ;;  %v671_v22 = vrot.slane %v622_v10, 2 }
 0x13e   :  { %v669_v17 = vrot.slane %v624_v13, 2  ;;  %v626_v18 = vpop.f32.mrb[19].mxu0  ;;  %v915_v19 = vrot.slane %v870_v15, 3  ;;  %v872_v20 = vpop.f32.mrb[19].mxu1 }
 0x13f   :  { %v672_v23 = vrot.slane %v626_v18, 2  ;;  %v918_v25 = vrot.slane %v872_v20, 3 }
 0x140   :  { %v670_v28 = vsel %vm667_vm1, %v668_v16, %v669_v17  ;;  %v916_v31 = vsel %vm913_vm2, %v914_v11, %v915_v19 }
 0x141   :  { %v690_v32 = vadd.f32 %v670_v28, %v3829_v6  ;;  %v673_v33 = vsel %vm667_vm1, %v671_v22, %v672_v23  ;;  %v919_v34 = vsel %vm913_vm2, %v917_v14, %v918_v25 }
 0x142   :  { %v691_v35 = vadd.f32 %v673_v33, %v3832_v8 }
 0x143   :  { %v3878_v36 = vadd.f32 %v916_v31, %v690_v32  ;;  %v630_v37 = vpop.f32.mrb[20].mxu0  ;;  %v876_v38 = vpop.f32.mrb[20].mxu1 }
 0x144   :  { %v3880_v39 = vadd.f32 %v919_v34, %v691_v35  ;;  %v674_v40 = vrot.slane %v630_v37, 2  ;;  %v632_v41 = vpop.f32.mrb[21].mxu0  ;;  %v920_v42 = vrot.slane %v876_v38, 3  ;;  %v878_v43 = vpop.f32.mrb[21].mxu1 }
 0x145   :  { %v676_v45 = vrot.slane %v632_v41, 2  ;;  %v634_v47 = vpop.f32.mrb[22].mxu0  ;;  %v922_v48 = vrot.slane %v878_v43, 3  ;;  %v880_v6 = vpop.f32.mrb[22].mxu1 }
 0x146   :  { %v675_v49 = vsel %vm667_vm1, %v669_v17, %v674_v40  ;;  %v678_v50 = vrot.slane %v634_v47, 2  ;;  %v921_v51 = vsel %vm913_vm2, %v915_v19, %v920_v42  ;;  %v636_v8 = vpop.f32.mrb[23].mxu0  ;;  %v924_v52 = vrot.slane %v880_v6, 3  ;;  %v882_v53 = vpop.f32.mrb[23].mxu1 }
 0x147   :  { %v692_v54 = vadd.f32 %v675_v49, %v3835_v21  ;;  %v677_v55 = vsel %vm667_vm1, %v672_v23, %v676_v45  ;;  %v680_v56 = vrot.slane %v636_v8, 2  ;;  %v923_v57 = vsel %vm913_vm2, %v918_v25, %v922_v48 }
 0x148   :  { %v693_v58 = vadd.f32 %v677_v55, %v3838_v24  ;;  %v679_v60 = vsel %vm667_vm1, %v674_v40, %v678_v50  ;;  %v696_v61 = vadd.f32 %v678_v50, %v3841_v26  ;;  %v925_v63 = vsel %vm913_vm2, %v920_v42, %v924_v52 }
 0x149   :  { %v694_v3 = vadd.f32 %v679_v60, %v3843_v27  ;;  %v3892_v7 = vadd.f32 %v921_v51, %v692_v54  ;;  %v681_v9 = vsel %vm667_vm1, %v676_v45, %v680_v56  ;;  %v697_v21 = vadd.f32 %v680_v56, %v3846_v29 }
 0x14a   :  { %v695_v10 = vadd.f32 %v681_v9, %v3848_v30  ;;  %v3897_v11 = vadd.f32 %v923_v57, %v693_v58  ;;  %v3899_v12 = vadd.f32 %v924_v52, %v696_v61  ;;  %v926_v24 = vrot.slane %v882_v53, 3 }
 0x14b   :  { %v3901_v13 = vadd.f32 %v925_v63, %v694_v3  ;;  %v640_v26 = vpop.f32.mrb[24].mxu0  ;;  %v886_v14 = vpop.f32.mrb[24].mxu1  ;;  %v1229_v42 = vlaneseq }
 0x14c   :  { %v927_v15 = vsel %vm913_vm2, %v922_v48, %v926_v24  ;;  %v3904_v27 = vadd.f32 %v926_v24, %v697_v21  ;;  %v642_v16 = vpop.f32.mrb[25].mxu0  ;;  %v952_v17 = vrot.slane %v886_v14, 3  ;;  %v888_v18 = vpop.f32.mrb[25].mxu1  ;;  %v706_v22 = vrot.slane %v640_v26, 2 }
 0x14d   :  { %v3906_v19 = vadd.f32 %v927_v15, %v695_v10  ;;  %v644_v29 = vpop.f32.mrb[26].mxu0  ;;  %v955_v30 = vrot.slane %v888_v18, 3  ;;  %v890_v20 = vpop.f32.mrb[26].mxu1  ;;  %v709_v32 = vrot.slane %v642_v16, 2  ;;  %v3918_v55 = vshrl.u32 %v1229_v42, 7 }
 0x14e   :  { %v707_v23 = vrot.slane %v644_v29, 2  ;;  %v646_v25 = vpop.f32.mrb[27].mxu0  ;;  %v953_v28 = vrot.slane %v890_v20, 3  ;;  %v892_v31 = vpop.f32.mrb[27].mxu1 }
 0x14f   :  { %v710_v33 = vrot.slane %v646_v25, 2  ;;  %v956_v34 = vrot.slane %v892_v31, 3 }
 0x150   :  { %v708_v35 = vsel %vm667_vm1, %v706_v22, %v707_v23  ;;  %v954_v37 = vsel %vm913_vm2, %v952_v17, %v953_v28  ;;  %v1231_v22 = vsub.s32 0, %v3918_v55 }
 0x151   :  { %v728_v38 = vadd.f32 %v708_v35, %v3851_v44  ;;  %v711_v40 = vsel %vm667_vm1, %v709_v32, %v710_v33  ;;  %v957_v41 = vsel %vm913_vm2, %v955_v30, %v956_v34 }
 0x152   :  { %v729_v43 = vadd.f32 %v711_v40, %v3854_v46 }
 0x153   :  { %v3914_v45 = vadd.f32 %v954_v37, %v728_v38  ;;  %v650_v47 = vpop.f32.mrb[28].mxu0  ;;  %v896_v48 = vpop.f32.mrb[28].mxu1 }
 0x154   :  { %v3916_v6 = vadd.f32 %v957_v41, %v729_v43  ;;  %v712_v49 = vrot.slane %v650_v47, 2  ;;  %v652_v50 = vpop.f32.mrb[29].mxu0  ;;  %v958_v51 = vrot.slane %v896_v48, 3  ;;  %v898_v8 = vpop.f32.mrb[29].mxu1 }
 0x155   :  { %v714_v52 = vrot.slane %v652_v50, 2  ;;  %v654_v53 = vpop.f32.mrb[30].mxu0  ;;  %v960_v44 = vrot.slane %v898_v8, 3  ;;  %v900_v54 = vpop.f32.mrb[30].mxu1 }
 0x156   :  { %v713_v56 = vsel %vm667_vm1, %v707_v23, %v712_v49  ;;  %v716_v57 = vrot.slane %v654_v53, 2  ;;  %v959_v46 = vsel %vm913_vm2, %v953_v28, %v958_v51  ;;  %v656_v58 = vpop.f32.mrb[31].mxu0  ;;  %v962_v60 = vrot.slane %v900_v54, 3  ;;  %v902_v61 = vpop.f32.mrb[31].mxu1 }
 0x157   :  { %v730_v63 = vadd.f32 %v713_v56, %v3857_v59  ;;  %v715_v3 = vsel %vm667_vm1, %v710_v33, %v714_v52  ;;  %v718_v9 = vrot.slane %v656_v58, 2  ;;  %v961_v21 = vsel %vm913_vm2, %v956_v34, %v960_v44  ;;  %v50_v28 = vld [vmem:[#allocation9] ss:$8 sm:$0x3] }
 0x158   :  { %v731_v10 = vadd.f32 %v715_v3, %v3860_v62  ;;  %v717_v24 = vsel %vm667_vm1, %v712_v49, %v716_v57  ;;  %v734_v26 = vadd.f32 %v716_v57, %v3863_v1  ;;  %v963_v14 = vsel %vm913_vm2, %v958_v51, %v962_v60 }
 0x159   :  { %v732_v15 = vadd.f32 %v717_v24, %v3865_v2  ;;  %v3930_v16 = vadd.f32 %v959_v46, %v730_v63  ;;  %v719_v17 = vsel %vm667_vm1, %v714_v52, %v718_v9  ;;  %v735_v59 = vadd.f32 %v718_v9, %v3868_v4 }
 0x15a   :  { %v733_v18 = vadd.f32 %v719_v17, %v3870_v5  ;;  %v3935_v29 = vadd.f32 %v961_v21, %v731_v10  ;;  %v3937_v30 = vadd.f32 %v962_v60, %v734_v26  ;;  %v964_v62 = vrot.slane %v902_v61, 3 }
 0x15b   :  { %v3939_v20 = vadd.f32 %v963_v14, %v732_v15  ;;  %v1112_v1 = vpop.f32.mrb[32].mxu0  ;;  %v1235_v4 = vsub.s32 1, %v3918_v55  ;;  %v3950_v37 = vrot.slane %v50_v28, %v1231_v22 }
 0x15c   :  { %v965_v2 = vsel %vm913_vm2, %v960_v44, %v964_v62  ;;  %v3943_v23 = vadd.f32 %v964_v62, %v735_v59  ;;  %v1114_v25 = vpop.f32.mrb[33].mxu0  ;;  %v1160_v32 = vrot.slane %v1112_v1, 4 }
 0x15d   :  { %v3946_v31 = vadd.f32 %v965_v2, %v733_v18  ;;  %v1116_v5 = vpop.f32.mrb[34].mxu0  ;;  %v1163_v35 = vrot.slane %v1114_v25, 4  ;;  %v3955_v41 = vrot.slane %v50_v28, %v1235_v4 }
 0x15e   :  { %v1161_v33 = vrot.slane %v1116_v5, 4  ;;  %v1118_v34 = vpop.f32.mrb[35].mxu0 }
 0x15f   :  { %v1164_v38 = vrot.slane %v1118_v34, 4 }
 0x160   :  { %v1162_v40 = vsel %vm1159_vm3, %v1160_v32, %v1161_v33 }
 0x161   :  { %v1182_v42 = vadd.f32 %v1162_v40, %v3878_v36  ;;  %v1165_v43 = vsel %vm1159_vm3, %v1163_v35, %v1164_v38 }
 0x162   :  { %v1183_v47 = vadd.f32 %v1165_v43, %v3880_v39 }
 0x163   :  { %v1239_v48 = vadd.f32 %v3950_v37, %v1182_v42  ;;  %v1122_v49 = vpop.f32.mrb[36].mxu0 }
 0x164   :  { %v1240_v50 = vadd.f32 %v3955_v41, %v1183_v47  ;;  %v1166_v51 = vrot.slane %v1122_v49, 4  ;;  %v1124_v8 = vpop.f32.mrb[37].mxu0 }
 0x165   :  { %v1247_v52 = vmax.f32 %v1239_v48, 0.0  ;;  %v1168_v53 = vrot.slane %v1124_v8, 4  ;;  %v1126_v44 = vpop.f32.mrb[38].mxu0 }
 0x166   :  { %v1248_v54 = vmax.f32 %v1240_v50, 0.0  ;;  %v1167_v56 = vsel %vm1159_vm3, %v1161_v33, %v1166_v51  ;;  %v1170_v57 = vrot.slane %v1126_v44, 4  ;;  %v1128_v46 = vpop.f32.mrb[39].mxu0 }
 0x167   :  { %v1184_v36 = vadd.f32 %v1167_v56, %v3892_v7  ;;  %v1169_v58 = vsel %vm1159_vm3, %v1164_v38, %v1168_v53  ;;  %v1172_v39 = vrot.slane %v1128_v46, 4 }
 0x168   :  { %v1255_v60 = vmax.f32 %v1247_v52, %v1248_v54  ;;  %v1185_v61 = vadd.f32 %v1169_v58, %v3897_v11  ;;  %v1171_v63 = vsel %vm1159_vm3, %v1166_v51, %v1170_v57  ;;  %v1188_v3 = vadd.f32 %v1170_v57, %v3899_v12 }
 0x169   :  { %v1241_v9 = vadd.f32 %v3950_v37, %v1184_v36  ;;  %v1186_v21 = vadd.f32 %v1171_v63, %v3901_v13  ;;  %v1173_v10 = vsel %vm1159_vm3, %v1168_v53, %v1172_v39  ;;  %v1189_v24 = vadd.f32 %v1172_v39, %v3904_v27 }
 0x16a   :  { %1259 = vst [vmem:[#allocation2] sm:$0xff] %v1255_v60  ;;  %v1242_v7 = vadd.f32 %v3955_v41, %v1185_v61  ;;  %v1245_v26 = vadd.f32 %v3950_v37, %v1188_v3  ;;  %v1187_v14 = vadd.f32 %v1173_v10, %v3906_v19 }
 0x16b   :  { %v1249_v11 = vmax.f32 %v1241_v9, 0.0  ;;  %v1243_v15 = vadd.f32 %v3950_v37, %v1186_v21  ;;  %v1246_v12 = vadd.f32 %v3955_v41, %v1189_v24  ;;  %v1132_v17 = vpop.f32.mrb[40].mxu0 }
 0x16c   :  { %v1250_v59 = vmax.f32 %v1242_v7, 0.0  ;;  %v1253_v18 = vmax.f32 %v1245_v26, 0.0  ;;  %v1244_v13 = vadd.f32 %v3955_v41, %v1187_v14  ;;  %v1134_v62 = vpop.f32.mrb[41].mxu0  ;;  %v1198_v5 = vrot.slane %v1132_v17, 4 }
 0x16d   :  { %v1251_v1 = vmax.f32 %v1243_v15, 0.0  ;;  %v1254_v27 = vmax.f32 %v1246_v12, 0.0  ;;  %v1136_v2 = vpop.f32.mrb[42].mxu0  ;;  %v1201_v34 = vrot.slane %v1134_v62, 4 }
 0x16e   :  { %v1256_v25 = vmax.f32 %v1249_v11, %v1250_v59  ;;  %v1252_v28 = vmax.f32 %v1244_v13, 0.0  ;;  %v1199_v32 = vrot.slane %v1136_v2, 4  ;;  %v1138_v33 = vpop.f32.mrb[43].mxu0 }
 0x16f   :  { %v1258_v19 = vmax.f32 %v1253_v18, %v1254_v27  ;;  %v1202_v35 = vrot.slane %v1138_v33, 4  ;;  %v3512_v33 = vld [vmem:[#allocation6 + $0x380] ss:$8 sps:$4 sm:$0xff]  }
 0x170   :  { %1260 = vst [vmem:[#allocation2 + $0x8] sm:$0xff] %v1256_v25  ;;  %v1257_v38 = vmax.f32 %v1251_v1, %v1252_v28  ;;  %v1200_v40 = vsel %vm1159_vm3, %v1198_v5, %v1199_v32 }
 0x171   :  { %1262 = vst [vmem:[#allocation2 + $0x18] sm:$0xf] %v1258_v19  ;;  %v1220_v42 = vadd.f32 %v1200_v40, %v3914_v45  ;;  %v1203_v43 = vsel %vm1159_vm3, %v1201_v34, %v1202_v35  ;;  %v3515_v19 = vld [vmem:[#allocation6 + $0x400] ss:$8 sps:$4 sm:$0xff]   ;;  %v3521_v34 = vld [vmem:[#allocation6 + $0x394] ss:$8 sps:$4 sm:$0xff]  }
 0x172   :  { %1261 = vst [vmem:[#allocation2 + $0x10] sm:$0xff] %v1257_v38  ;;  %v1221_v47 = vadd.f32 %v1203_v43, %v3916_v6  ;;  %v3519_v43 = vld [vmem:[#allocation6 + $0x390] ss:$8 sps:$4 sm:$0xff]  }
 0x173   :  { %v1263_v48 = vadd.f32 %v3950_v37, %v1220_v42  ;;  %v1142_v49 = vpop.f32.mrb[44].mxu0 }
 0x174   :  { %v1264_v50 = vadd.f32 %v3955_v41, %v1221_v47  ;;  %v1204_v51 = vrot.slane %v1142_v49, 4  ;;  %v1144_v8 = vpop.f32.mrb[45].mxu0  ;;  %v3522_v47 = vld [vmem:[#allocation6 + $0x410] ss:$8 sps:$4 sm:$0xff]   ;;  %v3530_v49 = vld [vmem:[#allocation6 + $0x424] ss:$8 sps:$4 sm:$0xff]  }
 0x175   :  { %v1271_v52 = vmax.f32 %v1263_v48, 0.0  ;;  %v1206_v53 = vrot.slane %v1144_v8, 4  ;;  %v1146_v44 = vpop.f32.mrb[46].mxu0  ;;  %v3527_v48 = vld [vmem:[#allocation6 + $0x3a4] ss:$8 sps:$4 sm:$0xff]  }
 0x176   :  { %v1272_v54 = vmax.f32 %v1264_v50, 0.0  ;;  %v1205_v56 = vsel %vm1159_vm3, %v1199_v32, %v1204_v51  ;;  %v1208_v57 = vrot.slane %v1146_v44, 4  ;;  %v1148_v45 = vpop.f32.mrb[47].mxu0  ;;  %v3525_v50 = vld [vmem:[#allocation6 + $0x3a0] ss:$8 sps:$4 sm:$0xff]  }
 0x177   :  { %v1222_v46 = vadd.f32 %v1205_v56, %v3930_v16  ;;  %v1207_v36 = vsel %vm1159_vm3, %v1202_v35, %v1206_v53  ;;  %v1210_v6 = vrot.slane %v1148_v45, 4  ;;  %v1287_v59 = vld [vmem:[#allocation2] ss:$2 sm:$0xff]  ;;  %v1295_v18 = vld [vmem:[#allocation2 + $0x1] ss:$2 sm:$0xff] }
 0x178   :  { %v1279_v58 = vmax.f32 %v1271_v52, %v1272_v54  ;;  %v1223_v39 = vadd.f32 %v1207_v36, %v3935_v29  ;;  %v1209_v60 = vsel %vm1159_vm3, %v1204_v51, %v1208_v57  ;;  %v1226_v3 = vadd.f32 %v1208_v57, %v3937_v30  ;;  %v3524_v35 = vld [vmem:[#allocation6 + $0x414] ss:$8 sps:$4 sm:$0xff]   ;;  %v3528_v51 = vld [vmem:[#allocation6 + $0x420] ss:$8 sps:$4 sm:$0xff]   ;;  %v3532_v44 = vld [vmem:[#allocation6 + $0x3b0] ss:$8 sps:$4 sm:$0xff]  }
 0x179   :  { %v1265_v61 = vadd.f32 %v3950_v37, %v1222_v46  ;;  %v1224_v63 = vadd.f32 %v1209_v60, %v3939_v20  ;;  %v1211_v9 = vsel %vm1159_vm3, %v1206_v53, %v1210_v6  ;;  %v1227_v10 = vadd.f32 %v1210_v6, %v3943_v23  ;;  %v3534_v8 = vld [vmem:[#allocation6 + $0x3b4] ss:$8 sps:$4 sm:$0xff]   ;;  %v3535_v54 = vld [vmem:[#allocation6 + $0x430] ss:$8 sps:$4 sm:$0xff]   ;;  %v3540_v56 = vld [vmem:[#allocation6 + $0x3c4] ss:$8 sps:$4 sm:$0xff]  }
 0x17a   :  { %1283 = vst [vmem:[#allocation2 + $0x1c] sm:$0xff] %v1279_v58  ;;  %v1266_v21 = vadd.f32 %v3955_v41, %v1223_v39  ;;  %v1225_v16 = vadd.f32 %v1211_v9, %v3946_v31  ;;  %v1269_v7 = vadd.f32 %v3950_v37, %v1226_v3  ;;  %v1302_v1 = vmax.f32 %v1287_v59, %v1295_v18  ;;  %v3537_v52 = vld [vmem:[#allocation6 + $0x434] ss:$8 sps:$4 sm:$0xff]   ;;  %v3543_v57 = vld [vmem:[#allocation6 + $0x444] ss:$8 sps:$4 sm:$0xff]  }
 0x17b   :  { %v1273_v24 = vmax.f32 %v1265_v61, 0.0  ;;  %v1267_v29 = vadd.f32 %v3950_v37, %v1224_v63  ;;  %v1270_v20 = vadd.f32 %v3955_v41, %v1227_v10  ;;  %v3538_v45 = vld [vmem:[#allocation6 + $0x3c0] ss:$8 sps:$4 sm:$0xff]   ;;  %v3546_v36 = vld [vmem:[#allocation6 + $0x3d4] ss:$8 sps:$4 sm:$0xff]  }
 0x17c   :  { %v1274_v26 = vmax.f32 %v1266_v21, 0.0  ;;  %v1268_v14 = vadd.f32 %v3955_v41, %v1225_v16  ;;  %v1277_v11 = vmax.f32 %v1269_v7, 0.0  ;;  %v3541_v46 = vld [vmem:[#allocation6 + $0x440] ss:$8 sps:$4 sm:$0xff]   ;;  %v3549_v6 = vld [vmem:[#allocation6 + $0x454] ss:$8 sps:$4 sm:$0xff]  }
 0x17d   :  { %v1275_v30 = vmax.f32 %v1267_v29, 0.0  ;;  %v1278_v17 = vmax.f32 %v1270_v20, 0.0  ;;  %v3544_v58 = vld [vmem:[#allocation6 + $0x3d0] ss:$8 sps:$4 sm:$0xff]   ;;  %v3552_v60 = vld [vmem:[#allocation6 + $0x3e4] ss:$8 sps:$4 sm:$0xff]  }
 0x17e   :  { %v1280_v15 = vmax.f32 %v1273_v24, %v1274_v26  ;;  %v1276_v12 = vmax.f32 %v1268_v14, 0.0  ;;  %v3547_v39 = vld [vmem:[#allocation6 + $0x450] ss:$8 sps:$4 sm:$0xff]   ;;  %v3555_v61 = vld [vmem:[#allocation6 + $0x464] ss:$8 sps:$4 sm:$0xff]  }
 0x17f   :  { %v1282_v23 = vmax.f32 %v1277_v11, %v1278_v17  ;;  %v3550_v63 = vld [vmem:[#allocation6 + $0x3e0] ss:$8 sps:$4 sm:$0xff]   ;;  %v3558_v9 = vld [vmem:[#allocation6 + $0x3f4] ss:$8 sps:$4 sm:$0xff]   ;;  %v3556_v16 = vld [vmem:[#allocation6 + $0x3f0] ss:$8 sps:$4 sm:$0xff]  }
 0x180   :  { %1284 = vst [vmem:[#allocation2 + $0x24] sm:$0xff] %v1280_v15  ;;  %v1281_v31 = vmax.f32 %v1275_v30, %v1276_v12  ;;  %v3553_v3 = vld [vmem:[#allocation6 + $0x460] ss:$8 sps:$4 sm:$0xff]   ;;  %v3561_v21 = vld [vmem:[#allocation6 + $0x474] ss:$8 sps:$4 sm:$0xff]  }
 0x181   :  { %v1289_v13 = vld [vmem:[#allocation2 + $0x10] ss:$2 sm:$0xff]  ;;  %v1297_v62 = vld [vmem:[#allocation2 + $0x11] ss:$2 sm:$0xff]  ;;  %1286 = vst [vmem:[#allocation2 + $0x34] sm:$0xf] %v1282_v23 }
 0x182   :  { %v1303_v27 = vmax.f32 %v1289_v13, %v1297_v62  ;;  %1285 = vst [vmem:[#allocation2 + $0x2c] sm:$0xff] %v1281_v31  ;;  %v3559_v10 = vld [vmem:[#allocation6 + $0x470] ss:$8 sps:$4 sm:$0xff]   ;;  %v3564_v24 = vld [vmem:[#allocation6 + $0x484] ss:$8 sps:$4 sm:$0xff]  }
 0x183   :  { %v3562_v29 = vld [vmem:[#allocation6 + $0x480] ss:$8 sps:$4 sm:$0xff]   ;;  %v3567_v7 = vld [vmem:[#allocation6 + $0x494] ss:$8 sps:$4 sm:$0xff]   ;;  %v3565_v26 = vld [vmem:[#allocation6 + $0x490] ss:$8 sps:$4 sm:$0xff]  }
 0x184   :  { %v3199_v37 = vpack.c.bf16 %v1303_v27, %v1302_v1  ;;  %v3570_v14 = vld [vmem:[#allocation6 + $0x4a4] ss:$8 sps:$4 sm:$0xff]   ;;  %v3568_v20 = vld [vmem:[#allocation6 + $0x4a0] ss:$8 sps:$4 sm:$0xff]   ;;  %v3573_v30 = vld [vmem:[#allocation6 + $0x4b4] ss:$8 sps:$4 sm:$0xff]  }
 0x185   :  { %v3571_v11 = vld [vmem:[#allocation6 + $0x4b0] ss:$8 sps:$4 sm:$0xff]   ;;  %v3576_v15 = vld [vmem:[#allocation6 + $0x4c4] ss:$8 sps:$4 sm:$0xff]   ;;  %v3574_v12 = vld [vmem:[#allocation6 + $0x4c0] ss:$8 sps:$4 sm:$0xff]  }
 0x186   :  { %3200 = vst [vmem:[#allocation3] sm:$0xff] %v3199_v37   ;;  %v3579_v17 = vld [vmem:[#allocation6 + $0x4d4] ss:$8 sps:$4 sm:$0xff]   ;;  %v3577_v59 = vld [vmem:[#allocation6 + $0x4d0] ss:$8 sps:$4 sm:$0xff]  }
 0x187   :  { %v3582_v18 = vld [vmem:[#allocation6 + $0x4e4] ss:$8 sps:$4 sm:$0xff]   ;;  %v3580_v31 = vld [vmem:[#allocation6 + $0x4e0] ss:$8 sps:$4 sm:$0xff]   ;;  %v3585_v23 = vld [vmem:[#allocation6 + $0x4f4] ss:$8 sps:$4 sm:$0xff]  }
 0x188   :  { %v3583_v13 = vld [vmem:[#allocation6 + $0x4f0] ss:$8 sps:$4 sm:$0xff]   ;;  %v3586_v62 = vld [vmem:[#allocation6 + $0x580] ss:$8 sps:$4 sm:$0xff]  }
 0x189   :  { %v1291_v2 = vld [vmem:[#allocation2 + $0x20] ss:$2 sm:$0xff]  ;;  %v1293_v41 = vld [vmem:[#allocation2 + $0x30] ss:$2 sm:$0xf] }
 0x18a   :  { %v1299_v25 = vld [vmem:[#allocation2 + $0x21] ss:$2 sm:$0xff]  ;;  %v1301_v28 = vld [vmem:[#allocation2 + $0x31] ss:$2 sm:$0xf] }
 0x18b   :  { %v1304_v5 = vmax.f32 %v1291_v2, %v1299_v25  ;;  %v1305_v32 = vmax.f32 %v1293_v41, %v1301_v28  ;;  %v3587_v1 = vld [vmem:[#allocation6 + $0x500] ss:$8 sps:$4 sm:$0xff]   ;;  %v3590_v2 = vld [vmem:[#allocation6 + $0x590] ss:$8 sps:$4 sm:$0xff]  }
 0x18c   :  { %v3588_v27 = vld [vmem:[#allocation6 + $0x680] ss:$8 sps:$4 sm:$0xff]   ;;  %v3591_v41 = vld [vmem:[#allocation6 + $0x510] ss:$8 sps:$4 sm:$0xff]  }
 0x18d   :  { %v3194_v38 = vpack.c.bf16 %v1304_v5, %v1304_v5  ;;  %v3195_v40 = vpack.c.bf16 %v1305_v32, %v1305_v32  ;;  %v4000_v42 = vld [vmem:[#allocation3] sm:$0xff]   ;;  %v3592_v25 = vld [vmem:[#allocation6 + $0x690] ss:$8 sps:$4 sm:$0xff]  }
 0x18e   :  { %1473 = vmatmul.mubr.bf16.vlgmr.msra.gmra.mrb[32].mxu1 %v4000_v42  ;;  %1620 = vmatmul.mubr.bf16.vlgmr.msra.gmra.mrb[48].mxu0 %v4000_v42  ;;  %v3589_v37 = vld [vmem:[#allocation6 + $0x600] ss:$8 sps:$4 sm:$0xff]   ;;  %v3593_v28 = vld [vmem:[#allocation6 + $0x610] ss:$8 sps:$4 sm:$0xff]  }
 0x18f   :  { %1325 = vst [vmem:[#allocation3 + $0xc] sm:$0x3] %v3195_v40  ;;  %1324 = vst [vmem:[#allocation3 + $0x8] sm:$0xf] %v3194_v38  ;;  %1775 = vmatpush1.bf16.msra.mxu1 %v3512_v33  ;;  %1960 = vmatpush1.bf16.msra.mxu0 %v3515_v19  ;;  %v3594_v5 = vld [vmem:[#allocation6 + $0x5a0] ss:$8 sps:$4 sm:$0xff]  }
 0x190   :  { %1776 = vmatprep.subr.bf16.mxu1 %v3521_v34  ;;  %1961 = vmatprep.subr.bf16.mxu0 %v3524_v35  ;;  %v3596_v32 = vld [vmem:[#allocation6 + $0x6a0] ss:$8 sps:$4 sm:$0xff]   ;;  %v3598_v19 = vld [vmem:[#allocation6 + $0x5b0] ss:$8 sps:$4 sm:$0xff]  }
 0x191   :  { %1482 = vmatprep.mubr.bf16.mxu1 %v3718_v0  ;;  %1629 = vmatprep.mubr.bf16.mxu0 %v3718_v0  ;;  %v3597_v33 = vld [vmem:[#allocation6 + $0x620] ss:$8 sps:$4 sm:$0xff]   ;;  %v3599_v34 = vld [vmem:[#allocation6 + $0x530] ss:$8 sps:$4 sm:$0xff]  }
 0x192   :  { %v3600_v35 = vld [vmem:[#allocation6 + $0x6b0] ss:$8 sps:$4 sm:$0xff]   ;;  %v3602_v40 = vld [vmem:[#allocation6 + $0x5c0] ss:$8 sps:$4 sm:$0xff]  }
 0x193   :  { %1777 = vmatpush1.bf16.msra.mxu1 %v3519_v43  ;;  %1962 = vmatpush1.bf16.msra.mxu0 %v3522_v47  ;;  %v3601_v38 = vld [vmem:[#allocation6 + $0x630] ss:$8 sps:$4 sm:$0xff]   ;;  %v3604_v43 = vld [vmem:[#allocation6 + $0x6c0] ss:$8 sps:$4 sm:$0xff]  }
 0x194   :  { %1778 = vmatprep.subr.bf16.mxu1 %v3527_v48  ;;  %1963 = vmatprep.subr.bf16.mxu0 %v3530_v49  ;;  %v3605_v47 = vld [vmem:[#allocation6 + $0x640] ss:$8 sps:$4 sm:$0xff]   ;;  %v3606_v48 = vld [vmem:[#allocation6 + $0x5d0] ss:$8 sps:$4 sm:$0xff]  }
 0x195   :  { %v3608_v49 = vld [vmem:[#allocation6 + $0x6d0] ss:$8 sps:$4 sm:$0xff]  }
 0x196   :  { %v4006_v53 = vld [vmem:[#allocation3 + $0x8] sm:$0x3f]  }
 0x197   :  { %1483 = vmatmul.mubr.bf16.gmra.mrb[36].mxu1 %v4006_v53  ;;  %1630 = vmatmul.mubr.bf16.gmra.mrb[52].mxu0 %v4006_v53 }
 0x198   :  { %1779 = vmatpush1.bf16.msra.mxu1 %v3525_v50  ;;  %1964 = vmatpush1.bf16.msra.mxu0 %v3528_v51  ;;  %v3607_v50 = vld [vmem:[#allocation6 + $0x550] ss:$8 sps:$4 sm:$0xff]  }
 0x199   :  { %1780 = vmatprep.subr.bf16.mxu1 %v3534_v8  ;;  %1965 = vmatprep.subr.bf16.mxu0 %v3537_v52  ;;  %v3609_v51 = vld [vmem:[#allocation6 + $0x650] ss:$8 sps:$4 sm:$0xff]   ;;  %v3610_v8 = vld [vmem:[#allocation6 + $0x5e0] ss:$8 sps:$4 sm:$0xff]  }
 0x19a   :  { %1806 = vmatprep.mubr.bf16.mxu1 %v3718_v0  ;;  %1991 = vmatprep.mubr.bf16.mxu0 %v3718_v0  ;;  %v3612_v52 = vld [vmem:[#allocation6 + $0x6e0] ss:$8 sps:$4 sm:$0xff]  }
 0x19c   :  { %1781 = vmatpush1.bf16.msra.mxu1 %v3532_v44  ;;  %1966 = vmatpush1.bf16.msra.mxu0 %v3535_v54  ;;  %v3613_v44 = vld [vmem:[#allocation6 + $0x660] ss:$8 sps:$4 sm:$0xff]   ;;  %v3614_v54 = vld [vmem:[#allocation6 + $0x5f0] ss:$8 sps:$4 sm:$0xff]  }
 0x19d   :  { %1782 = vmatprep.subr.bf16.mxu1 %v3540_v56  ;;  %1967 = vmatprep.subr.bf16.mxu0 %v3543_v57  ;;  %v3616_v56 = vld [vmem:[#allocation6 + $0x6f0] ss:$8 sps:$4 sm:$0xff]  }
 0x19e   :  { %v3615_v57 = vld [vmem:[#allocation6 + $0x570] ss:$8 sps:$4 sm:$0xff]  }
 0x1a0   :  { %1783 = vmatpush1.bf16.msra.mxu1 %v3538_v45  ;;  %1968 = vmatpush1.bf16.msra.mxu0 %v3541_v46  ;;  %v3617_v45 = vld [vmem:[#allocation6 + $0x670] ss:$8 sps:$4 sm:$0xff]   ;;  %v3719_v46 = vmov 0.0  }
 0x1a1   :  { %1784 = vmatprep.subr.bf16.mxu1 %v3546_v36  ;;  %1969 = vmatprep.subr.bf16.mxu0 %v3549_v6 }
 0x1a4   :  { %1785 = vmatpush1.bf16.msra.mxu1 %v3544_v58  ;;  %1970 = vmatpush1.bf16.msra.mxu0 %v3547_v39 }
 0x1a5   :  { %1786 = vmatprep.subr.bf16.mxu1 %v3552_v60  ;;  %1971 = vmatprep.subr.bf16.mxu0 %v3555_v61 }
 0x1a8   :  { %1787 = vmatpush1.bf16.msra.mxu1 %v3550_v63  ;;  %1972 = vmatpush1.bf16.msra.mxu0 %v3553_v3 }
 0x1a9   :  { %1788 = vmatprep.subr.bf16.mxu1 %v3558_v9  ;;  %1973 = vmatprep.subr.bf16.mxu0 %v3561_v21 }
 0x1ac   :  { %1789 = vmatpush1.bf16.msra.mxu1 %v3556_v16  ;;  %1974 = vmatpush1.bf16.msra.mxu0 %v3559_v10 }
 0x1ad   :  { %2144 = vmatprep.subr.bf16.mxu1 %v3564_v24  ;;  %3201 = vmatprep.subr.bf16.mxu0 %v3586_v62 }
 0x1af   :  { %1807 = vmatmul.mubr.bf16.vlgmr.msra.gmra.mrb[40].mxu1 %v4000_v42  ;;  %1992 = vmatmul.mubr.bf16.vlgmr.msra.gmra.mrb[56].mxu0 %v4000_v42 }
 0x1b0   :  { %2145 = vmatpush1.bf16.msra.mxu1 %v3562_v29  ;;  %1816 = vmatprep.mubr.bf16.mxu1 %v3718_v0 }
 0x1b1   :  { %2146 = vmatprep.subr.bf16.mxu1 %v3567_v7  ;;  %2001 = vmatprep.mubr.bf16.mxu0 %v3718_v0 }
 0x1b2   :  { %3202 = vmatpush3.bf16.msra.mxu0 %v3587_v1 }
 0x1b3   :  { %3203 = vmatprep.subr.bf16.mxu0 %v3590_v2 }
 0x1b4   :  { %2147 = vmatpush1.bf16.msra.mxu1 %v3565_v26 }
 0x1b5   :  { %2148 = vmatprep.subr.bf16.mxu1 %v3570_v14 }
 0x1b6   :  { %3204 = vmatpush3.bf16.msra.mxu0 %v3591_v41 }
 0x1b7   :  { %1817 = vmatmul.mubr.bf16.gmra.mrb[44].mxu1 %v4006_v53  ;;  %2002 = vmatmul.mubr.bf16.gmra.mrb[60].mxu0 %v4006_v53 }
 0x1b8   :  { %2149 = vmatpush1.bf16.msra.mxu1 %v3568_v20  ;;  %2176 = vmatprep.mubr.bf16.mxu1 %v3718_v0 }
 0x1b9   :  { %2150 = vmatprep.subr.bf16.mxu1 %v3573_v30  ;;  %3205 = vmatprep.subr.bf16.mxu0 %v3594_v5 }
 0x1bc   :  { %2151 = vmatpush1.bf16.msra.mxu1 %v3571_v11 }
 0x1bd   :  { %2152 = vmatprep.subr.bf16.mxu1 %v3576_v15 }
 0x1c0   :  { %2153 = vmatpush1.bf16.msra.mxu1 %v3574_v12 }
 0x1c1   :  { %2154 = vmatprep.subr.bf16.mxu1 %v3579_v17 }
 0x1c4   :  { %2155 = vmatpush1.bf16.msra.mxu1 %v3577_v59 }
 0x1c5   :  { %2156 = vmatprep.subr.bf16.mxu1 %v3582_v18 }
 0x1c8   :  { %2157 = vmatpush1.bf16.msra.mxu1 %v3580_v31 }
 0x1c9   :  { %2158 = vmatprep.subr.bf16.mxu1 %v3585_v23 }
 0x1cc   :  { %2159 = vmatpush1.bf16.msra.mxu1 %v3583_v13 }
 0x1cd   :  { %3223 = vmatprep.subr.bf16.mxu1 %v3588_v27 }
 0x1cf   :  { %2177 = vmatmul.mubr.bf16.vlgmr.msra.gmra.mrb[48].mxu1 %v4000_v42  ;;  %v3603_v42 = vld [vmem:[#allocation6 + $0x540] ss:$8 sps:$4 sm:$0xff]  }
 0x1d0   :  { %2186 = vmatprep.mubr.bf16.mxu1 %v3718_v0  ;;  %3224 = vmatpush3.bf16.msra.mxu1 %v3589_v37  ;;  %v3595_v0 = vld [vmem:[#allocation6 + $0x520] ss:$8 sps:$4 sm:$0xff]  }
 0x1d1   :  { %3225 = vmatprep.subr.bf16.mxu1 %v3592_v25  ;;  %3206 = vmatpush3.bf16.msra.mxu0 %v3595_v0 }
 0x1d2   :  { %3207 = vmatprep.subr.bf16.mxu0 %v3598_v19 }
 0x1d4   :  { %3226 = vmatpush3.bf16.msra.mxu1 %v3593_v28 }
 0x1d5   :  { %3227 = vmatprep.subr.bf16.mxu1 %v3596_v32  ;;  %3208 = vmatpush3.bf16.msra.mxu0 %v3599_v34 }
 0x1d6   :  { %3209 = vmatprep.subr.bf16.mxu0 %v3602_v40 }
 0x1d7   :  { %2187 = vmatmul.mubr.bf16.gmra.mrb[52].mxu1 %v4006_v53  ;;  %v3611_v53 = vld [vmem:[#allocation6 + $0x560] ss:$8 sps:$4 sm:$0xff]  }
 0x1d8   :  { %3228 = vmatpush3.bf16.msra.mxu1 %v3597_v33 }
 0x1d9   :  { %3229 = vmatprep.subr.bf16.mxu1 %v3600_v35  ;;  %3210 = vmatpush3.bf16.msra.mxu0 %v3603_v42 }
 0x1da   :  { %3211 = vmatprep.subr.bf16.mxu0 %v3606_v48 }
 0x1dc   :  { %3230 = vmatpush3.bf16.msra.mxu1 %v3601_v38 }
 0x1dd   :  { %3231 = vmatprep.subr.bf16.mxu1 %v3604_v43  ;;  %3212 = vmatpush3.bf16.msra.mxu0 %v3607_v50 }
 0x1de   :  { %3213 = vmatprep.subr.bf16.mxu0 %v3610_v8 }
 0x1e0   :  { %3232 = vmatpush3.bf16.msra.mxu1 %v3605_v47 }
 0x1e1   :  { %3233 = vmatprep.subr.bf16.mxu1 %v3608_v49  ;;  %3214 = vmatpush3.bf16.msra.mxu0 %v3611_v53 }
 0x1e2   :  { %3215 = vmatprep.subr.bf16.mxu0 %v3614_v54 }
 0x1e4   :  { %3234 = vmatpush3.bf16.msra.mxu1 %v3609_v51 }
 0x1e5   :  { %3235 = vmatprep.subr.bf16.mxu1 %v3612_v52  ;;  %3216 = vmatpush3.bf16.msra.mxu0 %v3615_v57 }
 0x1e6   :  { %3272 = vmatprep.subr.bf16.mxu0 %v3719_v46 }
 0x1e8   :  { %3236 = vmatpush3.bf16.msra.mxu1 %v3613_v44 }
 0x1e9   :  { %3237 = vmatprep.subr.bf16.mxu1 %v3616_v56 }
 0x1ec   :  { %3238 = vmatpush3.bf16.msra.mxu1 %v3617_v45 }
 0x1ed   :  { %3292 = vmatprep.subr.bf16.mxu1 %v3719_v46 }
 0x261   :  { %v1474_v36 = vpop.f32.mrb[32].mxu1  ;;  %v1621_v6 = vpop.f32.mrb[48].mxu0 }
 0x262   :  { %v1476_v58 = vpop.f32.mrb[33].mxu1  ;;  %v1623_v39 = vpop.f32.mrb[49].mxu0  ;;  %v1644_v63 = vrot.slane %v1621_v6, 1 }
 0x263   :  { %v1478_v60 = vpop.f32.mrb[34].mxu1  ;;  %v1625_v61 = vpop.f32.mrb[50].mxu0  ;;  %v1647_v16 = vrot.slane %v1623_v39, 1 }
 0x264   :  { %v1645_v3 = vrot.slane %v1625_v61, 1  ;;  %v1480_v9 = vpop.f32.mrb[35].mxu1  ;;  %v1627_v21 = vpop.f32.mrb[51].mxu0 }
 0x265   :  { %v1648_v10 = vrot.slane %v1627_v21, 1 }
 0x266   :  { %v1646_v24 = vsel %vm421_vm0, %v1644_v63, %v1645_v3  ;;  %v1656_v29 = vadd.f32 %v1645_v3, %v1478_v60 }
 0x267   :  { %v1654_v7 = vadd.f32 %v1646_v24, %v1474_v36  ;;  %v1649_v26 = vsel %vm421_vm0, %v1647_v16, %v1648_v10  ;;  %v1657_v14 = vadd.f32 %v1648_v10, %v1480_v9 }
 0x268   :  { %v1655_v20 = vadd.f32 %v1649_v26, %v1476_v58 }
 0x26a   :  { %v1484_v30 = vpop.f32.mrb[36].mxu1  ;;  %v1631_v11 = vpop.f32.mrb[52].mxu0 }
 0x26b   :  { %v1662_v15 = vrot.slane %v1631_v11, 1  ;;  %v1486_v12 = vpop.f32.mrb[37].mxu1  ;;  %v1633_v17 = vpop.f32.mrb[53].mxu0 }
 0x26c   :  { %v1664_v59 = vrot.slane %v1633_v17, 1  ;;  %v1488_v18 = vpop.f32.mrb[38].mxu1  ;;  %v1635_v31 = vpop.f32.mrb[54].mxu0 }
 0x26d   :  { %v1663_v23 = vsel %vm421_vm0, %v1645_v3, %v1662_v15  ;;  %v1666_v13 = vrot.slane %v1635_v31, 1  ;;  %v1489_v62 = vpop.f32.mrb[39].mxu1  ;;  %v1637_v1 = vpop.f32.mrb[55].mxu0 }
 0x26e   :  { %v1665_v27 = vsel %vm421_vm0, %v1648_v10, %v1664_v59  ;;  %v1668_v37 = vrot.slane %v1637_v1, 1  ;;  %v1674_v2 = vadd.f32 %v1663_v23, %v1478_v60 }
 0x26f   :  { %v1667_v41 = vsel %vm421_vm0, %v1662_v15, %v1666_v13  ;;  %v1675_v25 = vadd.f32 %v1665_v27, %v1480_v9 }
 0x270   :  { %v1676_v28 = vadd.f32 %v1667_v41, %v1484_v30  ;;  %v1669_v5 = vsel %vm421_vm0, %v1664_v59, %v1668_v37 }
 0x271   :  { %v1677_v0 = vadd.f32 %v1669_v5, %v1486_v12 }
 0x282   :  { %v1808_v32 = vpop.f32.mrb[40].mxu1  ;;  %v1993_v33 = vpop.f32.mrb[56].mxu0 }
 0x283   :  { %v1810_v19 = vpop.f32.mrb[41].mxu1  ;;  %v1995_v34 = vpop.f32.mrb[57].mxu0  ;;  %v1831_v40 = vrot.slane %v1808_v32, 2  ;;  %v2016_v42 = vrot.slane %v1993_v33, 3 }
 0x284   :  { %v1812_v35 = vpop.f32.mrb[42].mxu1  ;;  %v1997_v38 = vpop.f32.mrb[58].mxu0  ;;  %v1834_v50 = vrot.slane %v1810_v19, 2  ;;  %v2019_v51 = vrot.slane %v1995_v34, 3 }
 0x285   :  { %v1832_v43 = vrot.slane %v1812_v35, 2  ;;  %v2017_v47 = vrot.slane %v1997_v38, 3  ;;  %v1814_v48 = vpop.f32.mrb[43].mxu1  ;;  %v1999_v49 = vpop.f32.mrb[59].mxu0 }
 0x286   :  { %v1835_v8 = vrot.slane %v1814_v48, 2  ;;  %v2020_v52 = vrot.slane %v1999_v49, 3  ;;  %v1331_v32 = vld [vmem:[#allocation9 + $0x1] ss:$8 sm:$0x3] }
 0x287   :  { %v1833_v53 = vsel %vm667_vm1, %v1831_v40, %v1832_v43  ;;  %v1843_v44 = vadd.f32 %v1832_v43, %v1656_v29  ;;  %v2018_v54 = vsel %vm913_vm2, %v2016_v42, %v2017_v47  ;;  %v2237_v35 = vrot.slane %v1331_v32, %v1231_v22 }
 0x288   :  { %v1841_v56 = vadd.f32 %v1833_v53, %v1654_v7  ;;  %v1836_v57 = vsel %vm667_vm1, %v1834_v50, %v1835_v8  ;;  %v1844_v45 = vadd.f32 %v1835_v8, %v1657_v14  ;;  %v2021_v36 = vsel %vm913_vm2, %v2019_v51, %v2020_v52 }
 0x289   :  { %v2028_v6 = vadd.f32 %v2017_v47, %v1843_v44  ;;  %v1842_v58 = vadd.f32 %v1836_v57, %v1655_v20 }
 0x28a   :  { %v2026_v39 = vadd.f32 %v2018_v54, %v1841_v56  ;;  %v2029_v60 = vadd.f32 %v2020_v52, %v1844_v45  ;;  %v1818_v61 = vpop.f32.mrb[44].mxu1  ;;  %v2003_v63 = vpop.f32.mrb[60].mxu0 }
 0x28b   :  { %v2027_v3 = vadd.f32 %v2021_v36, %v1842_v58  ;;  %v1849_v9 = vrot.slane %v1818_v61, 2  ;;  %v1820_v21 = vpop.f32.mrb[45].mxu1  ;;  %v2005_v16 = vpop.f32.mrb[61].mxu0  ;;  %v2034_v7 = vrot.slane %v2003_v63, 3 }
 0x28c   :  { %v1850_v10 = vrot.slane %v1820_v21, 2  ;;  %v1822_v24 = vpop.f32.mrb[46].mxu1  ;;  %v2007_v29 = vpop.f32.mrb[62].mxu0  ;;  %v2035_v17 = vrot.slane %v2005_v16, 3 }
 0x28d   :  { %v1859_v26 = vadd.f32 %v1849_v9, %v1674_v2  ;;  %v1851_v30 = vrot.slane %v1822_v24, 2  ;;  %v2036_v11 = vrot.slane %v2007_v29, 3  ;;  %v1824_v14 = vpop.f32.mrb[47].mxu1  ;;  %v2009_v15 = vpop.f32.mrb[63].mxu0 }
 0x28e   :  { %v1860_v12 = vadd.f32 %v1850_v10, %v1675_v25  ;;  %v1853_v20 = vrot.slane %v1824_v14, 2  ;;  %v2038_v59 = vrot.slane %v2009_v15, 3 }
 0x28f   :  { %v2044_v18 = vadd.f32 %v2034_v7, %v1859_v26  ;;  %v1852_v31 = vsel %vm667_vm1, %v1849_v9, %v1851_v30  ;;  %v2037_v23 = vsel %vm913_vm2, %v2034_v7, %v2036_v11 }
 0x290   :  { %v2045_v13 = vadd.f32 %v2035_v17, %v1860_v12  ;;  %v1861_v62 = vadd.f32 %v1852_v31, %v1676_v28  ;;  %v1854_v1 = vsel %vm667_vm1, %v1850_v10, %v1853_v20  ;;  %v2039_v27 = vsel %vm913_vm2, %v2035_v17, %v2038_v59 }
 0x291   :  { %v1862_v37 = vadd.f32 %v1854_v1, %v1677_v0  ;;  %v2241_v28 = vrot.slane %v1331_v32, %v1235_v4 }
 0x292   :  { %v2046_v2 = vadd.f32 %v2037_v23, %v1861_v62  ;;  %v3618_v62 = vld [vmem:[#allocation6 + $0x700] ss:$8 sps:$4 sm:$0xff]  }
 0x293   :  { %v2047_v41 = vadd.f32 %v2039_v27, %v1862_v37 }
 0x2a2   :  { %v2178_v5 = vpop.f32.mrb[48].mxu1 }
 0x2a3   :  { %v2180_v25 = vpop.f32.mrb[49].mxu1  ;;  %v2201_v19 = vrot.slane %v2178_v5, 4 }
 0x2a4   :  { %v2182_v33 = vpop.f32.mrb[50].mxu1  ;;  %v2204_v40 = vrot.slane %v2180_v25, 4 }
 0x2a5   :  { %v2202_v34 = vrot.slane %v2182_v33, 4  ;;  %v2184_v38 = vpop.f32.mrb[51].mxu1  ;;  %v3619_v33 = vld [vmem:[#allocation6 + $0x710] ss:$8 sps:$4 sm:$0xff]  }
 0x2a6   :  { %v2205_v42 = vrot.slane %v2184_v38, 4  ;;  %v3623_v38 = vld [vmem:[#allocation6 + $0x750] ss:$8 sps:$4 sm:$0xff]  }
 0x2a7   :  { %v2203_v43 = vsel %vm1159_vm3, %v2201_v19, %v2202_v34  ;;  %v2213_v0 = vadd.f32 %v2202_v34, %v2028_v6  ;;  %v3620_v19 = vld [vmem:[#allocation6 + $0x720] ss:$8 sps:$4 sm:$0xff]   ;;  %v3621_v34 = vld [vmem:[#allocation6 + $0x730] ss:$8 sps:$4 sm:$0xff]  }
 0x2a8   :  { %v2211_v47 = vadd.f32 %v2203_v43, %v2026_v39  ;;  %v2206_v48 = vsel %vm1159_vm3, %v2204_v40, %v2205_v42  ;;  %v2214_v49 = vadd.f32 %v2205_v42, %v2029_v60  ;;  %v3624_v40 = vld [vmem:[#allocation6 + $0x760] ss:$8 sps:$4 sm:$0xff]   ;;  %v3625_v42 = vld [vmem:[#allocation6 + $0x770] ss:$8 sps:$4 sm:$0xff]  }
 0x2a9   :  { %v2246_v50 = vadd.f32 %v2237_v35, %v2213_v0  ;;  %v2212_v51 = vadd.f32 %v2206_v48, %v2027_v3  ;;  %v3626_v0 = vld [vmem:[#allocation6 + $0x780] ss:$8 sps:$4 sm:$0xff]  }
 0x2aa   :  { %v2244_v8 = vadd.f32 %v2237_v35, %v2211_v47  ;;  %v2247_v52 = vadd.f32 %v2241_v28, %v2214_v49  ;;  %v2188_v53 = vpop.f32.mrb[52].mxu1  ;;  %v3627_v47 = vld [vmem:[#allocation6 + $0x790] ss:$8 sps:$4 sm:$0xff]   ;;  %v3628_v48 = vld [vmem:[#allocation6 + $0x7a0] ss:$8 sps:$4 sm:$0xff]  }
 0x2ab   :  { %v2250_v44 = vmax.f32 %v2246_v50, 0.0  ;;  %v2245_v22 = vadd.f32 %v2241_v28, %v2212_v51  ;;  %v2219_v54 = vrot.slane %v2188_v53, 4  ;;  %v2190_v56 = vpop.f32.mrb[53].mxu1  ;;  %v3629_v49 = vld [vmem:[#allocation6 + $0x7b0] ss:$8 sps:$4 sm:$0xff]  }
 0x2ac   :  { %v2248_v57 = vmax.f32 %v2244_v8, 0.0  ;;  %v2251_v45 = vmax.f32 %v2247_v52, 0.0  ;;  %v2220_v55 = vrot.slane %v2190_v56, 4  ;;  %v2192_v4 = vpop.f32.mrb[54].mxu1  ;;  %v3630_v50 = vld [vmem:[#allocation6 + $0x7c0] ss:$8 sps:$4 sm:$0xff]  }
 0x2ad   :  { %v2249_v36 = vmax.f32 %v2245_v22, 0.0  ;;  %v2229_v58 = vadd.f32 %v2219_v54, %v2044_v18  ;;  %v2221_v6 = vrot.slane %v2192_v4, 4  ;;  %v2194_v39 = vpop.f32.mrb[55].mxu1  ;;  %v3631_v51 = vld [vmem:[#allocation6 + $0x7d0] ss:$8 sps:$4 sm:$0xff]  }
 0x2ae   :  { %v2253_v61 = vmax.f32 %v2250_v44, %v2251_v45  ;;  %v2230_v63 = vadd.f32 %v2220_v55, %v2045_v13  ;;  %v2223_v60 = vrot.slane %v2194_v39, 4  ;;  %v3632_v8 = vld [vmem:[#allocation6 + $0x7e0] ss:$8 sps:$4 sm:$0xff]   ;;  %v3633_v52 = vld [vmem:[#allocation6 + $0x7f0] ss:$8 sps:$4 sm:$0xff]  }
 0x2af   :  { %v2252_v9 = vmax.f32 %v2248_v57, %v2249_v36  ;;  %v2256_v3 = vadd.f32 %v2237_v35, %v2229_v58  ;;  %v2222_v21 = vsel %vm1159_vm3, %v2219_v54, %v2221_v6  ;;  %v3634_v53 = vld [vmem:[#allocation6 + $0x800] ss:$8 sps:$4 sm:$0xff]   ;;  %v3635_v44 = vld [vmem:[#allocation6 + $0x810] ss:$8 sps:$4 sm:$0xff]  }
 0x2b0   :  { %2255 = vst [vmem:[#allocation4 + $0x8] sm:$0x3] %v2253_v61  ;;  %v2257_v16 = vadd.f32 %v2241_v28, %v2230_v63  ;;  %v2231_v10 = vadd.f32 %v2222_v21, %v2046_v2  ;;  %v2224_v24 = vsel %vm1159_vm3, %v2220_v55, %v2223_v60  ;;  %v3636_v22 = vld [vmem:[#allocation6 + $0x820] ss:$8 sps:$4 sm:$0xff]   ;;  %v3637_v54 = vld [vmem:[#allocation6 + $0x830] ss:$8 sps:$4 sm:$0xff]  }
 0x2b1   :  { %2254 = vst [vmem:[#allocation4] sm:$0xff] %v2252_v9  ;;  %v2260_v29 = vmax.f32 %v2256_v3, 0.0  ;;  %v2232_v26 = vadd.f32 %v2224_v24, %v2047_v41  ;;  %v3638_v56 = vld [vmem:[#allocation6 + $0x840] ss:$8 sps:$4 sm:$0xff]   ;;  %v3639_v57 = vld [vmem:[#allocation6 + $0x850] ss:$8 sps:$4 sm:$0xff]  }
 0x2b2   :  { %v2261_v7 = vmax.f32 %v2257_v16, 0.0  ;;  %v2258_v30 = vadd.f32 %v2237_v35, %v2231_v10  ;;  %v3622_v35 = vld [vmem:[#allocation6 + $0x740] ss:$8 sps:$4 sm:$0xff]  }
 0x2b3   :  { %v2259_v11 = vadd.f32 %v2241_v28, %v2232_v26  ;;  %v2373_v4 = vld [vmem:[#allocation9 + $0x2] ss:$0 sm:$0xff] }
 0x2b4   :  { %v2264_v14 = vmax.f32 %v2260_v29, %v2261_v7  ;;  %v2262_v15 = vmax.f32 %v2258_v30, 0.0 }
 0x2b5   :  { %v2263_v12 = vmax.f32 %v2259_v11, 0.0  ;;  %v3640_v11 = vld [vmem:[#allocation6 + $0x860] ss:$8 sps:$4 sm:$0xff]  }
 0x2b6   :  { %2266 = vst [vmem:[#allocation4 + $0x4] sm:$0xc0] %v2264_v14  ;;  %v3641_v14 = vld [vmem:[#allocation6 + $0x870] ss:$8 sps:$4 sm:$0xff]  }
 0x2b7   :  { %v2265_v17 = vmax.f32 %v2262_v15, %v2263_v12  ;;  %v2752_v15 = vld [vmem:[#allocation9 + $0x3] ss:$0 sm:$0xff] }
 0x2b9   :  { %2267 = vst [vmem:[#allocation4 + $0xc] sm:$0xff] %v2265_v17 }
 0x2c0   :  { %v2268_v20 = vld [vmem:[#allocation4] ss:$2 sm:$0xff]  ;;  %v2272_v59 = vld [vmem:[#allocation4 + $0x1] ss:$2 sm:$0xff] }
 0x2c1   :  { %v2275_v18 = vmax.f32 %v2268_v20, %v2272_v59  ;;  %v2270_v31 = vld [vmem:[#allocation4 + $0x10] ss:$2 sm:$0x3]  ;;  %v2274_v23 = vld [vmem:[#allocation4 + $0x11] ss:$2 sm:$0x3] }
 0x2c2   :  { %v2276_v13 = vmax.f32 %v2270_v31, %v2274_v23 }
 0x2c3   :  { %2277 = vst [vmem:[#allocation5] sm:$0xff] %v2275_v18 }
 0x2c4   :  { %2278 = vst [vmem:[#allocation5 + $0x8] sm:$0x3] %v2276_v13  ;;  %v2859_v13 = vld [vmem:[#allocation9 + $0x4] ss:$0 sm:$0xff] }
 0x2ca   :  { %v2281_v1 = vld [vmem:[#allocation5 + $0x1] ss:$5 sm:$0x3]  ;;  %v2279_v27 = vld [vmem:[#allocation5] ss:$5 sm:$0x3] }
 0x2cb   :  { %v2289_v37 = vpack.c.bf16 %v2281_v1, %v2281_v1  ;;  %v2285_v2 = vld [vmem:[#allocation5 + $0x3] ss:$5 sm:$0x3]  ;;  %v2288_v41 = vpack.c.bf16 %v2279_v27, %v2279_v27  ;;  %v2283_v5 = vld [vmem:[#allocation5 + $0x2] ss:$5 sm:$0x3] }
 0x2cc   :  { %v2291_v32 = vpack.c.bf16 %v2285_v2, %v2285_v2  ;;  %v2290_v25 = vpack.c.bf16 %v2283_v5, %v2283_v5  ;;  %v2287_v28 = vld [vmem:[#allocation5 + $0x4] ss:$5 sm:$0x3] }
 0x2cd   :  { %2646 = vmatprep.mubr.bf16.mxu0 %v2289_v37  ;;  %v2292_v43 = vpack.c.bf16 %v2287_v28, %v2287_v28 }
 0x2ce   :  { %2686 = vmatprep.mubr.bf16.mxu1 %v2291_v32  ;;  %2647 = vmatmul.mubr.bf16.vlgmr.msra.gmra.mrb[64].mxu0 %v2288_v41 }
 0x2cf   :  { %2687 = vmatmul.mubr.bf16.vlgmr.msra.gmra.mrb[56].mxu1 %v2290_v25  ;;  %3273 = vmatpush3.bf16.msra.mxu0 %v3618_v62 }
 0x2d0   :  { %3274 = vmatprep.subr.bf16.mxu0 %v3719_v46  ;;  %3288 = vmatprep.mubr.msk.bf16.mxu0 %vm3720_vm4, %v3719_v46 }
 0x2d1   :  { %3308 = vmatprep.mubr.msk.bf16.mxu1 %vm3720_vm4, %v3719_v46  ;;  %3293 = vmatpush3.bf16.msra.mxu1 %v3626_v0 }
 0x2d2   :  { %3294 = vmatprep.subr.bf16.mxu1 %v3719_v46 }
 0x2d3   :  { %3275 = vmatpush3.bf16.msra.mxu0 %v3619_v33 }
 0x2d4   :  { %3276 = vmatprep.subr.bf16.mxu0 %v3719_v46 }
 0x2d5   :  { %3295 = vmatpush3.bf16.msra.mxu1 %v3627_v47 }
 0x2d6   :  { %3296 = vmatprep.subr.bf16.mxu1 %v3719_v46 }
 0x2d7   :  { %3277 = vmatpush3.bf16.msra.mxu0 %v3620_v19 }
 0x2d8   :  { %3278 = vmatprep.subr.bf16.mxu0 %v3719_v46 }
 0x2d9   :  { %3297 = vmatpush3.bf16.msra.mxu1 %v3628_v48 }
 0x2da   :  { %3298 = vmatprep.subr.bf16.mxu1 %v3719_v46 }
 0x2db   :  { %3279 = vmatpush3.bf16.msra.mxu0 %v3621_v34 }
 0x2dc   :  { %3280 = vmatprep.subr.bf16.mxu0 %v3719_v46 }
 0x2dd   :  { %3299 = vmatpush3.bf16.msra.mxu1 %v3629_v49 }
 0x2de   :  { %3300 = vmatprep.subr.bf16.mxu1 %v3719_v46 }
 0x2df   :  { %3281 = vmatpush3.bf16.msra.mxu0 %v3622_v35 }
 0x2e0   :  { %3282 = vmatprep.subr.bf16.mxu0 %v3719_v46 }
 0x2e1   :  { %3301 = vmatpush3.bf16.msra.mxu1 %v3630_v50 }
 0x2e2   :  { %3302 = vmatprep.subr.bf16.mxu1 %v3719_v46 }
 0x2e3   :  { %3283 = vmatpush3.bf16.msra.mxu0 %v3623_v38 }
 0x2e4   :  { %3284 = vmatprep.subr.bf16.mxu0 %v3719_v46 }
 0x2e5   :  { %3303 = vmatpush3.bf16.msra.mxu1 %v3631_v51 }
 0x2e6   :  { %3304 = vmatprep.subr.bf16.mxu1 %v3719_v46 }
 0x2e7   :  { %3285 = vmatpush3.bf16.msra.mxu0 %v3624_v40 }
 0x2e8   :  { %3286 = vmatprep.subr.bf16.mxu0 %v3719_v46 }
 0x2e9   :  { %3305 = vmatpush3.bf16.msra.mxu1 %v3632_v8 }
 0x2ea   :  { %3306 = vmatprep.subr.bf16.mxu1 %v3719_v46 }
 0x2eb   :  { %3287 = vmatpush3.bf16.msra.mxu0 %v3625_v42 }
 0x2ec   :  { %3312 = vmatprep.subr.bf16.mxu0 %v3719_v46 }
 0x2ed   :  { %3307 = vmatpush3.bf16.msra.mxu1 %v3633_v52 }
 0x2ee   :  { %3289 = vmatmul.mubr.bf16.vlgmr.msra.gmra.mrb[68].mxu0 %v2292_v43 }
 0x2ef   :  { %3328 = vmatprep.mubr.msk.bf16.mxu0 %vm3720_vm4, %v3719_v46  ;;  %3313 = vmatpush3.bf16.msra.mxu0 %v3634_v53 }
 0x2f0   :  { %3314 = vmatprep.subr.bf16.mxu0 %v3719_v46 }
 0x2f3   :  { %3315 = vmatpush3.bf16.msra.mxu0 %v3635_v44 }
 0x2f4   :  { %3316 = vmatprep.subr.bf16.mxu0 %v3719_v46 }
 0x2f7   :  { %3317 = vmatpush3.bf16.msra.mxu0 %v3636_v22 }
 0x2f8   :  { %3318 = vmatprep.subr.bf16.mxu0 %v3719_v46 }
 0x2fb   :  { %3319 = vmatpush3.bf16.msra.mxu0 %v3637_v54 }
 0x2fc   :  { %3320 = vmatprep.subr.bf16.mxu0 %v3719_v46 }
 0x2ff   :  { %3321 = vmatpush3.bf16.msra.mxu0 %v3638_v56 }
 0x300   :  { %3322 = vmatprep.subr.bf16.mxu0 %v3719_v46 }
 0x303   :  { %3323 = vmatpush3.bf16.msra.mxu0 %v3639_v57 }
 0x304   :  { %3324 = vmatprep.subr.bf16.mxu0 %v3719_v46 }
 0x307   :  { %3325 = vmatpush3.bf16.msra.mxu0 %v3640_v11 }
 0x308   :  { %3326 = vmatprep.subr.bf16.mxu0 %v3719_v46 }
 0x30b   :  { %3327 = vmatpush3.bf16.msra.mxu0 %v3641_v14 }
 0x3a1   :  { %v3217_v45 = vpop.f32.mrb[64].mxu0 }
 0x3a2   :  { %v3239_v55 = vpop.f32.mrb[56].mxu1  ;;  %v3218_v36 = vpop.f32.mrb[65].mxu0 }
 0x3a3   :  { %v3219_v58 = vadd.f32 %v3218_v36, %v3217_v45  ;;  %v3240_v6 = vpop.f32.mrb[57].mxu1  ;;  %v3220_v39 = vpop.f32.mrb[66].mxu0 }
 0x3a4   :  { %v3241_v61 = vadd.f32 %v3240_v6, %v3239_v55  ;;  %v3242_v63 = vpop.f32.mrb[58].mxu1  ;;  %v3221_v60 = vpop.f32.mrb[67].mxu0 }
 0x3a5   :  { %v2649_v9 = vadd.f32 %v3219_v58, %v2373_v4  ;;  %v3243_v3 = vpop.f32.mrb[59].mxu1 }
 0x3a7   :  { %v2689_v21 = vadd.f32 %v3241_v61, %v2649_v9 }
 0x3c1   :  { %v2728_v16 = vpop.f32.mrb[68].mxu0 }
 0x3c2   :  { %v2729_v10 = vadd.f32 %v2728_v16, %v2689_v21  ;;  %v3290_v24 = vpop.f32.mrb[69].mxu0 }
 0x3c3   :  { %v2731_v29 = vpop.f32.mrb[70].mxu0 }
 0x3c4   :  { %v2734_v26 = vmax.f32 %v2729_v10, 0.0  ;;  %v3291_v7 = vpop.f32.mrb[71].mxu0 }
 0x3c6   :  { %v2735_v30 = vpack.c.bf16 %v2734_v26, %v2734_v26 }
 0x3c8   :  { %3309 = vmatmul.mubr.bf16.vlgmr.msra.gmra.mrb[60].mxu1 %v2735_v30 }
 0x49b   :  { %v2835_v12 = vpop.f32.mrb[60].mxu1 }
 0x49c   :  { %v2836_v17 = vadd.f32 %v2835_v12, %v2752_v15  ;;  %v3310_v20 = vpop.f32.mrb[61].mxu1 }
 0x49d   :  { %v2838_v59 = vpop.f32.mrb[62].mxu1 }
 0x49e   :  { %v2841_v18 = vmax.f32 %v2836_v17, 0.0  ;;  %v3311_v31 = vpop.f32.mrb[63].mxu1 }
 0x4a0   :  { %v2842_v23 = vpack.c.bf16 %v2841_v18, %v2841_v18 }
 0x4a2   :  { %3329 = vmatmul.mubr.bf16.vlgmr.msra.gmra.mrb[72].mxu0 %v2842_v23 }
 0x575   :  { %v2942_v62 = vpop.f32.mrb[72].mxu0 }
 0x576   :  { %v2943_v1 = vadd.f32 %v2942_v62, %v2859_v13  ;;  %v3330_v27 = vpop.f32.mrb[73].mxu0 }
 0x577   :  { %v2945_v46 = vpop.f32.mrb[74].mxu0 }
 0x578   :  { %v3331_v37 = vpop.f32.mrb[75].mxu0  ;;  %2949 = vst.msk [vmem:[#allocation11] sm:$0x3] %vm2948_vm5, %v2943_v1 }
 0x579   :  { %3697 = shalt.err (!%p3694_p6)
}
 0x57a   :  { %s3698_s21 = scalar_lea.hbm %s4089_s3, 32 }
 0x57b   :  { %p3699_p7 = scmp.ne.s32.totalorder %s4089_s3, %s3698_s21  ;;  %p3702_p8 = scmp.lt.u32.totalorder %s3698_s21, %s4089_s3 }
 0x57d   :  { %p3704_p9 = pnand %p3702_p8, %p3699_p7 }
 0x57f   :  { %3707 = shalt.err (!%p3704_p9)
}
 0x580   :  { %2959 = dma.vmem_to_hbm [thread:$0]  %s2957_s17, 32, %s4089_s3, [#allocation8]  }
 0x581   :  { %3712 = dma.done.wait [#allocation8], 32  }
 0x582   :  { %3713 = vsyncadd [#allocation8], 4294967264 }
 0x583   :  { %2963 = vsyncpa [#allocation7], 1 }
 0x584   :  { %2964 = vsyncpa [#allocation10], 1 }
 0x585   :  { %2965 = vsyncpa [#allocation8], 1 }

</bundles_post_ra>
